<compile_context>
chip_gen: v7x
topology: tpu7x:2x2x1
jax: 0.10.0
libtpu: 0.0.40
codegen_flags: <defaults>
</compile_context>

<pallas_src>
import functools

import jax
import jax.numpy as jnp
from jax import lax
from jax.experimental import pallas as pl
from jax.experimental.pallas import tpu as pltpu


# --------------------------- tile selection ----------------------------------

@functools.lru_cache(maxsize=None)
def _is_v5e():
    # Per-generation tile choice: v5e's MXU is 4x128^2 with one vst slot, so
    # prefer 128-wide tiles there; 256-wide (and tk=384/512) on v6e/v7x.
    try:
        kind = jax.devices()[0].device_kind.lower()
        return ("v5e" in kind) or ("v5 lite" in kind) or ("v5litepod" in kind)
    except Exception:
        return False


def _pick_tile(dim, candidates, align):
    """Largest candidate dividing `dim`; else the largest divisor of `dim`
    that is a multiple of `align`; else the full dim (always a legal block).
    # TODO(synk): pad-and-mask path for awkward (prime-ish) dims instead of a
    # tiny-divisor / full-extent fallback."""
    for c in candidates:
        if dim % c == 0:
            return c
    cap = max(candidates)
    for d in range(cap - (cap % align), align - 1, -align):
        if dim % d == 0:
            return d
    return dim


def _matmul_tiles(M, K, Nout):
    if _is_v5e():
        tm_c, tn_c, tk_c = (128,), (128,), (256, 128)
    else:
        tm_c, tn_c, tk_c = (256, 128), (256, 128), (512, 384, 256, 128)
    tm = _pick_tile(M, tm_c, 8)        # sublane dim: multiple of 8
    tn = _pick_tile(Nout, tn_c, 128)   # lane dim: multiple of 128 (or full)
    tk = _pick_tile(K, tk_c, 128)
    return tm, tn, tk


# ------------------------------ linear kernel --------------------------------

def _linear_kernel(x_ref, w_ref, o_ref, acc_ref):
    # x_ref: (tm, tk); w_ref: (tk, tn) -- weight pre-transposed at param prep,
    # so the MXU sees a canonical NN contraction (no per-tile transpose).
    @pl.when(pl.program_id(2) == 0)
    def _():
        acc_ref[...] = jnp.zeros_like(acc_ref)

    acc_ref[...] += jnp.dot(x_ref[...], w_ref[...],
                            preferred_element_type=jnp.float32)

    @pl.when(pl.program_id(2) == pl.num_programs(2) - 1)
    def _():
        o_ref[...] = acc_ref[...].astype(o_ref.dtype)


def _pallas_linear(x, w_t):
    """y = x @ w_t, with w_t already in (in, out) orientation."""
    M, K = x.shape
    K2, Nout = w_t.shape
    assert K == K2
    tm, tn, tk = _matmul_tiles(M, K, Nout)
    grid = (M // tm, Nout // tn, K // tk)

    xi = jnp.dtype(x.dtype).itemsize
    wi = jnp.dtype(w_t.dtype).itemsize
    needed = (2 * (tm * tk * xi + tm * tn * xi) + 2 * tk * tn * wi
              + tm * tn * 4 + (4 << 20))
    vmem_limit = int(min(max(needed, 32 << 20), 100 << 20))

    return pl.pallas_call(
        _linear_kernel,
        out_shape=jax.ShapeDtypeStruct((M, Nout), x.dtype),
        grid=grid,
        in_specs=[pl.BlockSpec((tm, tk), lambda i, j, k: (i, k)),
                  pl.BlockSpec((tk, tn), lambda i, j, k: (k, j))],
        out_specs=pl.BlockSpec((tm, tn), lambda i, j, k: (i, j)),
        scratch_shapes=[pltpu.VMEM((tm, tn), jnp.float32)],
        compiler_params=pltpu.CompilerParams(
            dimension_semantics=("parallel", "parallel", "arbitrary"),
            vmem_limit_bytes=vmem_limit),
    )(x, w_t)


# ------------------- attention + fused output projection ---------------------

def _attn_proj_kernel(q_ref, kv_ref, w_ref, b_ref, o_ref, *,
                      num_heads, head_dim, tkv):
    # q_ref : (1, tq, C)   channels head-major (h*D + d); scale pre-folded in.
    # kv_ref: (1, N, 2C)   [k head-major | v head-major], full KV per batch.
    # w_ref : (C, C)       output-projection weight, (in, out) orientation.
    # b_ref : (1, C)       output-projection bias.
    C = num_heads * head_dim
    tq = q_ref.shape[1]
    N = kv_ref.shape[1]
    num_kv = N // tkv

    q = q_ref[0]                                            # (tq, C), model dtype
    q_heads = [q[:, h * head_dim:(h + 1) * head_dim] for h in range(num_heads)]

    # Online-softmax over KV tiles: per-head live set is (tq, tkv) + (tq, D);
    # the (N, N) scores never materialize (required for v7x's 64 MiB VMEM at
    # real TimeSformer sequence lengths).
    def kv_step(i, carry):
        ms, ls, accs = carry
        start = pl.multiple_of(i * tkv, tkv)
        kv_t = kv_ref[0, pl.ds(start, tkv), :]              # one (tkv, 2C) load
        new_ms, new_ls, new_accs = [], [], []
        for h in range(num_heads):
            k_h = kv_t[:, h * head_dim:(h + 1) * head_dim]
            v_h = kv_t[:, C + h * head_dim:C + (h + 1) * head_dim]
            # q k^T without a transpose: contract both operands on head_dim.
            s = lax.dot_general(q_heads[h], k_h,
                                (((1,), (1,)), ((), ())),
                                preferred_element_type=jnp.float32)  # (tq, tkv)
            m_new = jnp.maximum(ms[h], jnp.max(s, axis=-1, keepdims=True))
            alpha = jnp.exp(ms[h] - m_new)
            p = jnp.exp(s - m_new)                          # f32 exp (v5e-safe)
            l_new = alpha * ls[h] + jnp.sum(p, axis=-1, keepdims=True)
            acc_new = alpha * accs[h] + lax.dot_general(
                p.astype(v_h.dtype), v_h,                    # bf16 MXU feed
                (((1,), (0,)), ((), ())),
                preferred_element_type=jnp.float32)
            new_ms.append(m_new)
            new_ls.append(l_new)
            new_accs.append(acc_new)
        return tuple(new_ms), tuple(new_ls), tuple(new_accs)

    ms0 = tuple(jnp.full((tq, 1), -jnp.inf, jnp.float32)
                for _ in range(num_heads))
    ls0 = tuple(jnp.zeros((tq, 1), jnp.float32) for _ in range(num_heads))
    accs0 = tuple(jnp.zeros((tq, head_dim), jnp.float32)
                  for _ in range(num_heads))
    ms, ls, accs = lax.fori_loop(0, num_kv, kv_step, (ms0, ls0, accs0))

    outs = []
    for h in range(num_heads):
        # EUP approximate reciprocal + one Newton step; safe because the
        # softmax denominator is >= 1 after max subtraction.
        r = pl.reciprocal(ls[h], approx=True)
        r = r * (2.0 - ls[h] * r)
        outs.append(accs[h] * r)
    o = jnp.concatenate(outs, axis=-1)                      # (tq, C) f32

    # Fused output projection + bias: w_proj stays VMEM-resident across the
    # whole grid, no HBM round trip of the (B, N, C) attention output, and a
    # single lane-dense (1, tq, C) store.
    y = lax.dot_general(o.astype(w_ref.dtype), w_ref[...],
                        (((1,), (0,)), ((), ())),
                        preferred_element_type=jnp.float32)
    o_ref[0] = (y + b_ref[...].astype(jnp.float32)).astype(o_ref.dtype)


def _pallas_attention_proj(q, kv, w_proj_t, b_proj, num_heads, head_dim):
    B, N, C = q.shape
    tq = _pick_tile(N, (128,) if _is_v5e() else (256, 128), 8)
    tkv = _pick_tile(N, (256, 128) if _is_v5e() else (512, 256, 128), 8)
    grid = (B, N // tq)

    it = jnp.dtype(q.dtype).itemsize
    needed = (2 * (tq * C * it + N * 2 * C * it + tq * C * it)
              + C * C * jnp.dtype(w_proj_t.dtype).itemsize
              + C * jnp.dtype(b_proj.dtype).itemsize + (8 << 20))
    vmem_limit = int(min(max(needed, 32 << 20), 100 << 20))

    kernel = functools.partial(_attn_proj_kernel, num_heads=num_heads,
                               head_dim=head_dim, tkv=tkv)
    return pl.pallas_call(
        kernel,
        out_shape=jax.ShapeDtypeStruct((B, N, C), q.dtype),
        grid=grid,
        in_specs=[
            pl.BlockSpec((1, tq, C), lambda b, qi: (b, qi, 0)),
            pl.BlockSpec((1, N, 2 * C), lambda b, qi: (b, 0, 0)),
            pl.BlockSpec((C, C), lambda b, qi: (0, 0)),
            pl.BlockSpec((1, C), lambda b, qi: (0, 0)),
        ],
        out_specs=pl.BlockSpec((1, tq, C), lambda b, qi: (b, qi, 0)),
        compiler_params=pltpu.CompilerParams(
            dimension_semantics=("parallel", "parallel"),
            vmem_limit_bytes=vmem_limit),
    )(q, kv, w_proj_t, b_proj)


# ------------------------------ public API ------------------------------------

def prepare_attention_params(raw_params, num_heads):
    """One-time host-side transform of PyTorch-oriented weights.

    raw_params: w_qkv (3C, C), w_proj (C, C), b_proj (C,)  [PyTorch (out, in)].
    Folds `scale` into the q half and pre-transposes everything so the kernels
    use canonical (in, out) contractions.  Call once, outside jit.
    """
    w_qkv = jnp.asarray(raw_params["w_qkv"])
    w_proj = jnp.asarray(raw_params["w_proj"])
    b_proj = jnp.asarray(raw_params["b_proj"])
    C = w_proj.shape[0]
    head_dim = C // num_heads
    assert head_dim * num_heads == C
    scale = head_dim ** (-0.5)
    return {
        "w_q_t": (w_qkv[:C] * scale).T,   # (C, C), out cols head-major (h*D+d)
        "w_kv_t": w_qkv[C:].T,            # (C, 2C), [k head-major | v head-major]
        "w_proj_t": w_proj.T,             # (C, C)
        "b_proj": b_proj.reshape(1, C),   # (1, C)
    }
    # TODO(synk): qkv_bias=True path (module default is bias=False).


def attention_forward(x, params, num_heads):
    """Pallas equivalent of timesformer Attention.forward (with_qkv=True)."""
    B, N, C = x.shape
    head_dim = C // num_heads
    x2d = x.reshape(B * N, C)

    q = _pallas_linear(x2d, params["w_q_t"]).reshape(B, N, C)        # scale folded
    kv = _pallas_linear(x2d, params["w_kv_t"]).reshape(B, N, 2 * C)

    return _pallas_attention_proj(q, kv, params["w_proj_t"], params["b_proj"],
                                  num_heads, head_dim)
    # TODO(synk): with_qkv=False path and dropout (attn_drop/proj_drop = 0.0
    # in the module defaults -> identity) are not implemented.


# Pure-JAX reference (uses the raw PyTorch-oriented weights).
def attention_reference(x, raw_params, num_heads):
    B, N, C = x.shape
    head_dim = C // num_heads
    scale = head_dim ** (-0.5)
    qkv = x @ raw_params["w_qkv"].T
    qkv = qkv.reshape(B, N, 3, num_heads, head_dim)
    qkv = jnp.transpose(qkv, (2, 0, 3, 1, 4))
    q, k, v = qkv[0], qkv[1], qkv[2]
    attn = jnp.einsum("bhqd,bhkd->bhqk", q, k) * scale
    attn = jax.nn.softmax(attn, axis=-1)
    o = jnp.einsum("bhqk,bhkd->bhqd", attn, v)
    o = jnp.transpose(o, (0, 2, 1, 3)).reshape(B, N, C)
    return o @ raw_params["w_proj"].T + raw_params["b_proj"]


if __name__ == "__main__":
    # Small, module-consistent shapes: batch=2, seq=8, dim=32, heads=8 (D=4).
    B, N, C, H = 2, 8, 32, 8

    key = jax.random.PRNGKey(0)
    kx, kw1, kw2, kb2 = jax.random.split(key, 4)

    x = jax.random.normal(kx, (B, N, C), dtype=jnp.float32)
    raw_params = {
        "w_qkv": jax.random.normal(kw1, (3 * C, C), dtype=jnp.float32) * 0.05,
        "w_proj": jax.random.normal(kw2, (C, C), dtype=jnp.float32) * 0.05,
        "b_proj": jax.random.normal(kb2, (C,), dtype=jnp.float32) * 0.01,
    }

    params = prepare_attention_params(raw_params, H)      # one-time host prep
    out = jax.jit(attention_forward, static_argnums=2)(x, params, H)
    jax.block_until_ready(out)

    ref = attention_reference(x, raw_params, H)
    assert out.shape == (B, N, C)
    assert jnp.allclose(out, ref, rtol=1e-3, atol=1e-4), "mismatch vs reference"

    print("KERNEL_OK")
</pallas_src>

<mosaic_0001>
module attributes {stable_mosaic.version = 11 : i64} {
  func.func @_linear_kernel(%arg0: i32, %arg1: i32, %arg2: i32, %arg3: memref<16x32xf32, #tpu.memory_space<vmem>>, %arg4: memref<32x32xf32, #tpu.memory_space<vmem>>, %arg5: memref<16x32xf32, #tpu.memory_space<vmem>>, %arg6: memref<16x32xf32, #tpu.memory_space<vmem>>) attributes {dimension_semantics = [#tpu.dimension_semantics<parallel>, #tpu.dimension_semantics<parallel>, #tpu.dimension_semantics<arbitrary>], iteration_bounds = array<i64: 1, 1, 1>, scalar_prefetch = 0 : i64, scratch_operands = 1 : i64, tpu.core_type = #tpu.core_type<tc>, window_params = [{transform_indices = @transform_0, window_bounds = array<i64: 16, 32>}, {transform_indices = @transform_1, window_bounds = array<i64: 32, 32>}, {transform_indices = @transform_2, window_bounds = array<i64: 16, 32>}]} {
    %c0_i32 = arith.constant 0 : i32
    %0 = arith.cmpi eq, %arg2, %c0_i32 : i32
    %1 = arith.extui %0 : i1 to i32
    %c0_i32_0 = arith.constant 0 : i32
    %2 = arith.cmpi ne, %1, %c0_i32_0 : i32
    scf.if %2 {
      %cst_10 = arith.constant 0.000000e+00 : f32
      %12 = vector.broadcast %cst_10 : f32 to vector<16x32xf32>
      %c0_11 = arith.constant 0 : index
      %c0_12 = arith.constant 0 : index
      %13 = vector.load %arg6[%c0_11, %c0_12] : memref<16x32xf32, #tpu.memory_space<vmem>>, vector<16x32xf32>
      tpu.vector_store %arg6[%c0_11, %c0_12], %12 {strides = array<i32>} : memref<16x32xf32, #tpu.memory_space<vmem>>, vector<16x32xf32>,
    } else {
    }
    %c0 = arith.constant 0 : index
    %c0_1 = arith.constant 0 : index
    %3 = vector.load %arg6[%c0, %c0_1] : memref<16x32xf32, #tpu.memory_space<vmem>>, vector<16x32xf32>
    %c0_2 = arith.constant 0 : index
    %c0_3 = arith.constant 0 : index
    %4 = vector.load %arg3[%c0_2, %c0_3] : memref<16x32xf32, #tpu.memory_space<vmem>>, vector<16x32xf32>
    %c0_4 = arith.constant 0 : index
    %c0_5 = arith.constant 0 : index
    %5 = vector.load %arg4[%c0_4, %c0_5] : memref<32x32xf32, #tpu.memory_space<vmem>>, vector<32x32xf32>
    %cst = arith.constant dense<0.000000e+00> : vector<16x32xf32>
    %6 = tpu.matmul %4, %5, %cst {dimension_numbers = #tpu.dot_dimension_numbers<[1], [0], [0], [1], [0, 0, 1, 1], [], []>} : vector<16x32xf32>, vector<32x32xf32>, vector<16x32xf32> -> vector<16x32xf32>
    %7 = arith.addf %3, %6 : vector<16x32xf32>
    %c0_6 = arith.constant 0 : index
    %c0_7 = arith.constant 0 : index
    %8 = vector.load %arg6[%c0_6, %c0_7] : memref<16x32xf32, #tpu.memory_space<vmem>>, vector<16x32xf32>
    tpu.vector_store %arg6[%c0_6, %c0_7], %7 {strides = array<i32>} : memref<16x32xf32, #tpu.memory_space<vmem>>, vector<16x32xf32>,
    %c0_i32_8 = arith.constant 0 : i32
    %9 = arith.cmpi eq, %arg2, %c0_i32_8 : i32
    %10 = arith.extui %9 : i1 to i32
    %c0_i32_9 = arith.constant 0 : i32
    %11 = arith.cmpi ne, %10, %c0_i32_9 : i32
    scf.if %11 {
      %c0_10 = arith.constant 0 : index
      %c0_11 = arith.constant 0 : index
      %12 = vector.load %arg6[%c0_10, %c0_11] : memref<16x32xf32, #tpu.memory_space<vmem>>, vector<16x32xf32>
      %c0_12 = arith.constant 0 : index
      %c0_13 = arith.constant 0 : index
      %13 = vector.load %arg5[%c0_12, %c0_13] : memref<16x32xf32, #tpu.memory_space<vmem>>, vector<16x32xf32>
      tpu.vector_store %arg5[%c0_12, %c0_13], %12 {strides = array<i32>} : memref<16x32xf32, #tpu.memory_space<vmem>>, vector<16x32xf32>,
    } else {
    }
    return
  }
  func.func @transform_0(%arg0: i32, %arg1: i32, %arg2: i32) -> (i32, i32) {
    %c0_i32 = arith.constant 0 : i32
    return %arg0, %arg2 : i32, i32
  }
  func.func @transform_1(%arg0: i32, %arg1: i32, %arg2: i32) -> (i32, i32) {
    %c0_i32 = arith.constant 0 : i32
    return %arg2, %arg1 : i32, i32
  }
  func.func @transform_2(%arg0: i32, %arg1: i32, %arg2: i32) -> (i32, i32) {
    %c0_i32 = arith.constant 0 : i32
    return %arg0, %arg1 : i32, i32
  }
}

module attributes {stable_mosaic.version = 11 : i64} {
  func.func @_linear_kernel(%arg0: i32, %arg1: i32, %arg2: i32, %arg3: memref<16x32xf32, #tpu.memory_space<vmem>>, %arg4: memref<32x64xf32, #tpu.memory_space<vmem>>, %arg5: memref<16x64xf32, #tpu.memory_space<vmem>>, %arg6: memref<16x64xf32, #tpu.memory_space<vmem>>) attributes {dimension_semantics = [#tpu.dimension_semantics<parallel>, #tpu.dimension_semantics<parallel>, #tpu.dimension_semantics<arbitrary>], iteration_bounds = array<i64: 1, 1, 1>, scalar_prefetch = 0 : i64, scratch_operands = 1 : i64, tpu.core_type = #tpu.core_type<tc>, window_params = [{transform_indices = @transform_0, window_bounds = array<i64: 16, 32>}, {transform_indices = @transform_1, window_bounds = array<i64: 32, 64>}, {transform_indices = @transform_2, window_bounds = array<i64: 16, 64>}]} {
    %c0_i32 = arith.constant 0 : i32
    %0 = arith.cmpi eq, %arg2, %c0_i32 : i32
    %1 = arith.extui %0 : i1 to i32
    %c0_i32_0 = arith.constant 0 : i32
    %2 = arith.cmpi ne, %1, %c0_i32_0 : i32
    scf.if %2 {
      %cst_10 = arith.constant 0.000000e+00 : f32
      %12 = vector.broadcast %cst_10 : f32 to vector<16x64xf32>
      %c0_11 = arith.constant 0 : index
      %c0_12 = arith.constant 0 : index
      %13 = vector.load %arg6[%c0_11, %c0_12] : memref<16x64xf32, #tpu.memory_space<vmem>>, vector<16x64xf32>
      tpu.vector_store %arg6[%c0_11, %c0_12], %12 {strides = array<i32>} : memref<16x64xf32, #tpu.memory_space<vmem>>, vector<16x64xf32>,
    } else {
    }
    %c0 = arith.constant 0 : index
    %c0_1 = arith.constant 0 : index
    %3 = vector.load %arg6[%c0, %c0_1] : memref<16x64xf32, #tpu.memory_space<vmem>>, vector<16x64xf32>
    %c0_2 = arith.constant 0 : index
    %c0_3 = arith.constant 0 : index
    %4 = vector.load %arg3[%c0_2, %c0_3] : memref<16x32xf32, #tpu.memory_space<vmem>>, vector<16x32xf32>
    %c0_4 = arith.constant 0 : index
    %c0_5 = arith.constant 0 : index
    %5 = vector.load %arg4[%c0_4, %c0_5] : memref<32x64xf32, #tpu.memory_space<vmem>>, vector<32x64xf32>
    %cst = arith.constant dense<0.000000e+00> : vector<16x64xf32>
    %6 = tpu.matmul %4, %5, %cst {dimension_numbers = #tpu.dot_dimension_numbers<[1], [0], [0], [1], [0, 0, 1, 1], [], []>} : vector<16x32xf32>, vector<32x64xf32>, vector<16x64xf32> -> vector<16x64xf32>
    %7 = arith.addf %3, %6 : vector<16x64xf32>
    %c0_6 = arith.constant 0 : index
    %c0_7 = arith.constant 0 : index
    %8 = vector.load %arg6[%c0_6, %c0_7] : memref<16x64xf32, #tpu.memory_space<vmem>>, vector<16x64xf32>
    tpu.vector_store %arg6[%c0_6, %c0_7], %7 {strides = array<i32>} : memref<16x64xf32, #tpu.memory_space<vmem>>, vector<16x64xf32>,
    %c0_i32_8 = arith.constant 0 : i32
    %9 = arith.cmpi eq, %arg2, %c0_i32_8 : i32
    %10 = arith.extui %9 : i1 to i32
    %c0_i32_9 = arith.constant 0 : i32
    %11 = arith.cmpi ne, %10, %c0_i32_9 : i32
    scf.if %11 {
      %c0_10 = arith.constant 0 : index
      %c0_11 = arith.constant 0 : index
      %12 = vector.load %arg6[%c0_10, %c0_11] : memref<16x64xf32, #tpu.memory_space<vmem>>, vector<16x64xf32>
      %c0_12 = arith.constant 0 : index
      %c0_13 = arith.constant 0 : index
      %13 = vector.load %arg5[%c0_12, %c0_13] : memref<16x64xf32, #tpu.memory_space<vmem>>, vector<16x64xf32>
      tpu.vector_store %arg5[%c0_12, %c0_13], %12 {strides = array<i32>} : memref<16x64xf32, #tpu.memory_space<vmem>>, vector<16x64xf32>,
    } else {
    }
    return
  }
  func.func @transform_0(%arg0: i32, %arg1: i32, %arg2: i32) -> (i32, i32) {
    %c0_i32 = arith.constant 0 : i32
    return %arg0, %arg2 : i32, i32
  }
  func.func @transform_1(%arg0: i32, %arg1: i32, %arg2: i32) -> (i32, i32) {
    %c0_i32 = arith.constant 0 : i32
    return %arg2, %arg1 : i32, i32
  }
  func.func @transform_2(%arg0: i32, %arg1: i32, %arg2: i32) -> (i32, i32) {
    %c0_i32 = arith.constant 0 : i32
    return %arg0, %arg1 : i32, i32
  }
}

module attributes {stable_mosaic.version = 11 : i64} {
  func.func @_attn_proj_kernel(%arg0: i32, %arg1: i32, %arg2: memref<1x8x32xf32, #tpu.memory_space<vmem>>, %arg3: memref<1x8x64xf32, #tpu.memory_space<vmem>>, %arg4: memref<32x32xf32, #tpu.memory_space<vmem>>, %arg5: memref<1x32xf32, #tpu.memory_space<vmem>>, %arg6: memref<1x8x32xf32, #tpu.memory_space<vmem>>) attributes {dimension_semantics = [#tpu.dimension_semantics<parallel>, #tpu.dimension_semantics<parallel>], iteration_bounds = array<i64: 2, 1>, scalar_prefetch = 0 : i64, scratch_operands = 0 : i64, tpu.core_type = #tpu.core_type<tc>, window_params = [{transform_indices = @transform_0, window_bounds = array<i64: 1, 8, 32>}, {transform_indices = @transform_1, window_bounds = array<i64: 1, 8, 64>}, {pipeline_mode = #tpu.pipeline_mode<synchronous>, transform_indices = @transform_2, window_bounds = array<i64: 32, 32>}, {pipeline_mode = #tpu.pipeline_mode<synchronous>, transform_indices = @transform_3, window_bounds = array<i64: 1, 32>}, {transform_indices = @transform_4, window_bounds = array<i64: 1, 8, 32>}]} {
    %c0 = arith.constant 0 : index
    %c0_0 = arith.constant 0 : index
    %c0_1 = arith.constant 0 : index
    %0 = vector.load %arg2[%c0, %c0_0, %c0_1] : memref<1x8x32xf32, #tpu.memory_space<vmem>>, vector<1x8x32xf32>
    %1 = vector.shape_cast %0 : vector<1x8x32xf32> to vector<8x32xf32>
    %2 = vector.extract_strided_slice %1 {offsets = [0, 0], sizes = [8, 4], strides = [1, 1]} : vector<8x32xf32> to vector<8x4xf32>
    %3 = vector.extract_strided_slice %1 {offsets = [0, 4], sizes = [8, 4], strides = [1, 1]} : vector<8x32xf32> to vector<8x4xf32>
    %4 = vector.extract_strided_slice %1 {offsets = [0, 8], sizes = [8, 4], strides = [1, 1]} : vector<8x32xf32> to vector<8x4xf32>
    %5 = vector.extract_strided_slice %1 {offsets = [0, 12], sizes = [8, 4], strides = [1, 1]} : vector<8x32xf32> to vector<8x4xf32>
    %6 = vector.extract_strided_slice %1 {offsets = [0, 16], sizes = [8, 4], strides = [1, 1]} : vector<8x32xf32> to vector<8x4xf32>
    %7 = vector.extract_strided_slice %1 {offsets = [0, 20], sizes = [8, 4], strides = [1, 1]} : vector<8x32xf32> to vector<8x4xf32>
    %8 = vector.extract_strided_slice %1 {offsets = [0, 24], sizes = [8, 4], strides = [1, 1]} : vector<8x32xf32> to vector<8x4xf32>
    %9 = vector.extract_strided_slice %1 {offsets = [0, 28], sizes = [8, 4], strides = [1, 1]} : vector<8x32xf32> to vector<8x4xf32>
    %cst = arith.constant 0xFF800000 : f32
    %10 = vector.broadcast %cst : f32 to vector<8x1xf32>
    %cst_2 = arith.constant 0xFF800000 : f32
    %11 = vector.broadcast %cst_2 : f32 to vector<8x1xf32>
    %cst_3 = arith.constant 0xFF800000 : f32
    %12 = vector.broadcast %cst_3 : f32 to vector<8x1xf32>
    %cst_4 = arith.constant 0xFF800000 : f32
    %13 = vector.broadcast %cst_4 : f32 to vector<8x1xf32>
    %cst_5 = arith.constant 0xFF800000 : f32
    %14 = vector.broadcast %cst_5 : f32 to vector<8x1xf32>
    %cst_6 = arith.constant 0xFF800000 : f32
    %15 = vector.broadcast %cst_6 : f32 to vector<8x1xf32>
    %cst_7 = arith.constant 0xFF800000 : f32
    %16 = vector.broadcast %cst_7 : f32 to vector<8x1xf32>
    %cst_8 = arith.constant 0xFF800000 : f32
    %17 = vector.broadcast %cst_8 : f32 to vector<8x1xf32>
    %cst_9 = arith.constant 0.000000e+00 : f32
    %18 = vector.broadcast %cst_9 : f32 to vector<8x1xf32>
    %cst_10 = arith.constant 0.000000e+00 : f32
    %19 = vector.broadcast %cst_10 : f32 to vector<8x1xf32>
    %cst_11 = arith.constant 0.000000e+00 : f32
    %20 = vector.broadcast %cst_11 : f32 to vector<8x1xf32>
    %cst_12 = arith.constant 0.000000e+00 : f32
    %21 = vector.broadcast %cst_12 : f32 to vector<8x1xf32>
    %cst_13 = arith.constant 0.000000e+00 : f32
    %22 = vector.broadcast %cst_13 : f32 to vector<8x1xf32>
    %cst_14 = arith.constant 0.000000e+00 : f32
    %23 = vector.broadcast %cst_14 : f32 to vector<8x1xf32>
    %cst_15 = arith.constant 0.000000e+00 : f32
    %24 = vector.broadcast %cst_15 : f32 to vector<8x1xf32>
    %cst_16 = arith.constant 0.000000e+00 : f32
    %25 = vector.broadcast %cst_16 : f32 to vector<8x1xf32>
    %cst_17 = arith.constant 0.000000e+00 : f32
    %26 = vector.broadcast %cst_17 : f32 to vector<8x4xf32>
    %cst_18 = arith.constant 0.000000e+00 : f32
    %27 = vector.broadcast %cst_18 : f32 to vector<8x4xf32>
    %cst_19 = arith.constant 0.000000e+00 : f32
    %28 = vector.broadcast %cst_19 : f32 to vector<8x4xf32>
    %cst_20 = arith.constant 0.000000e+00 : f32
    %29 = vector.broadcast %cst_20 : f32 to vector<8x4xf32>
    %cst_21 = arith.constant 0.000000e+00 : f32
    %30 = vector.broadcast %cst_21 : f32 to vector<8x4xf32>
    %cst_22 = arith.constant 0.000000e+00 : f32
    %31 = vector.broadcast %cst_22 : f32 to vector<8x4xf32>
    %cst_23 = arith.constant 0.000000e+00 : f32
    %32 = vector.broadcast %cst_23 : f32 to vector<8x4xf32>
    %cst_24 = arith.constant 0.000000e+00 : f32
    %33 = vector.broadcast %cst_24 : f32 to vector<8x4xf32>
    %c0_i32 = arith.constant 0 : i32
    %c8_i32 = arith.constant 8 : i32
    %34 = arith.muli %c0_i32, %c8_i32 : i32
    %35 = tpu.assume_multiple %34, 8 : i32
    %c0_25 = arith.constant 0 : index
    %36 = arith.index_cast %35 : i32 to index
    %c0_26 = arith.constant 0 : index
    %37 = vector.load %arg3[%c0_25, %36, %c0_26] : memref<1x8x64xf32, #tpu.memory_space<vmem>>, vector<1x8x64xf32>
    %38 = vector.shape_cast %37 : vector<1x8x64xf32> to vector<8x64xf32>
    %39 = vector.extract_strided_slice %38 {offsets = [0, 0], sizes = [8, 4], strides = [1, 1]} : vector<8x64xf32> to vector<8x4xf32>
    %40 = vector.extract_strided_slice %38 {offsets = [0, 32], sizes = [8, 4], strides = [1, 1]} : vector<8x64xf32> to vector<8x4xf32>
    %cst_27 = arith.constant dense<0.000000e+00> : vector<8x8xf32>
    %41 = tpu.matmul %2, %39, %cst_27 {dimension_numbers = #tpu.dot_dimension_numbers<[1], [1], [0], [0], [0, 0, 1, 0], [], []>} : vector<8x4xf32>, vector<8x4xf32>, vector<8x8xf32> -> vector<8x8xf32>
    %cst_28 = arith.constant dense<0xFF800000> : vector<8xf32>
    %42 = vector.multi_reduction <maximumf>, %41, %cst_28 [1] : vector<8x8xf32> to vector<8xf32>
    %43 = vector.shape_cast %42 : vector<8xf32> to vector<8x1xf32>
    %44 = arith.maximumf %10, %43 : vector<8x1xf32>
    %45 = arith.subf %10, %44 : vector<8x1xf32>
    %46 = math.exp %45 : vector<8x1xf32>
    %47 = vector.broadcast %44 : vector<8x1xf32> to vector<8x8xf32>
    %48 = arith.subf %41, %47 : vector<8x8xf32>
    %49 = math.exp %48 : vector<8x8xf32>
    %50 = arith.mulf %46, %18 : vector<8x1xf32>
    %cst_29 = arith.constant dense<0.000000e+00> : vector<8xf32>
    %51 = vector.multi_reduction <add>, %49, %cst_29 [1] : vector<8x8xf32> to vector<8xf32>
    %52 = vector.shape_cast %51 : vector<8xf32> to vector<8x1xf32>
    %53 = arith.addf %50, %52 : vector<8x1xf32>
    %54 = vector.broadcast %46 : vector<8x1xf32> to vector<8x4xf32>
    %55 = arith.mulf %54, %26 : vector<8x4xf32>
    %cst_30 = arith.constant dense<0.000000e+00> : vector<8x4xf32>
    %56 = tpu.matmul %49, %40, %cst_30 {dimension_numbers = #tpu.dot_dimension_numbers<[1], [0], [0], [1], [0, 0, 1, 1], [], []>} : vector<8x8xf32>, vector<8x4xf32>, vector<8x4xf32> -> vector<8x4xf32>
    %57 = arith.addf %55, %56 : vector<8x4xf32>
    %58 = vector.extract_strided_slice %38 {offsets = [0, 4], sizes = [8, 4], strides = [1, 1]} : vector<8x64xf32> to vector<8x4xf32>
    %59 = vector.extract_strided_slice %38 {offsets = [0, 36], sizes = [8, 4], strides = [1, 1]} : vector<8x64xf32> to vector<8x4xf32>
    %cst_31 = arith.constant dense<0.000000e+00> : vector<8x8xf32>
    %60 = tpu.matmul %3, %58, %cst_31 {dimension_numbers = #tpu.dot_dimension_numbers<[1], [1], [0], [0], [0, 0, 1, 0], [], []>} : vector<8x4xf32>, vector<8x4xf32>, vector<8x8xf32> -> vector<8x8xf32>
    %cst_32 = arith.constant dense<0xFF800000> : vector<8xf32>
    %61 = vector.multi_reduction <maximumf>, %60, %cst_32 [1] : vector<8x8xf32> to vector<8xf32>
    %62 = vector.shape_cast %61 : vector<8xf32> to vector<8x1xf32>
    %63 = arith.maximumf %11, %62 : vector<8x1xf32>
    %64 = arith.subf %11, %63 : vector<8x1xf32>
    %65 = math.exp %64 : vector<8x1xf32>
    %66 = vector.broadcast %63 : vector<8x1xf32> to vector<8x8xf32>
    %67 = arith.subf %60, %66 : vector<8x8xf32>
    %68 = math.exp %67 : vector<8x8xf32>
    %69 = arith.mulf %65, %19 : vector<8x1xf32>
    %cst_33 = arith.constant dense<0.000000e+00> : vector<8xf32>
    %70 = vector.multi_reduction <add>, %68, %cst_33 [1] : vector<8x8xf32> to vector<8xf32>
    %71 = vector.shape_cast %70 : vector<8xf32> to vector<8x1xf32>
    %72 = arith.addf %69, %71 : vector<8x1xf32>
    %73 = vector.broadcast %65 : vector<8x1xf32> to vector<8x4xf32>
    %74 = arith.mulf %73, %27 : vector<8x4xf32>
    %cst_34 = arith.constant dense<0.000000e+00> : vector<8x4xf32>
    %75 = tpu.matmul %68, %59, %cst_34 {dimension_numbers = #tpu.dot_dimension_numbers<[1], [0], [0], [1], [0, 0, 1, 1], [], []>} : vector<8x8xf32>, vector<8x4xf32>, vector<8x4xf32> -> vector<8x4xf32>
    %76 = arith.addf %74, %75 : vector<8x4xf32>
    %77 = vector.extract_strided_slice %38 {offsets = [0, 8], sizes = [8, 4], strides = [1, 1]} : vector<8x64xf32> to vector<8x4xf32>
    %78 = vector.extract_strided_slice %38 {offsets = [0, 40], sizes = [8, 4], strides = [1, 1]} : vector<8x64xf32> to vector<8x4xf32>
    %cst_35 = arith.constant dense<0.000000e+00> : vector<8x8xf32>
    %79 = tpu.matmul %4, %77, %cst_35 {dimension_numbers = #tpu.dot_dimension_numbers<[1], [1], [0], [0], [0, 0, 1, 0], [], []>} : vector<8x4xf32>, vector<8x4xf32>, vector<8x8xf32> -> vector<8x8xf32>
    %cst_36 = arith.constant dense<0xFF800000> : vector<8xf32>
    %80 = vector.multi_reduction <maximumf>, %79, %cst_36 [1] : vector<8x8xf32> to vector<8xf32>
    %81 = vector.shape_cast %80 : vector<8xf32> to vector<8x1xf32>
    %82 = arith.maximumf %12, %81 : vector<8x1xf32>
    %83 = arith.subf %12, %82 : vector<8x1xf32>
    %84 = math.exp %83 : vector<8x1xf32>
    %85 = vector.broadcast %82 : vector<8x1xf32> to vector<8x8xf32>
    %86 = arith.subf %79, %85 : vector<8x8xf32>
    %87 = math.exp %86 : vector<8x8xf32>
    %88 = arith.mulf %84, %20 : vector<8x1xf32>
    %cst_37 = arith.constant dense<0.000000e+00> : vector<8xf32>
    %89 = vector.multi_reduction <add>, %87, %cst_37 [1] : vector<8x8xf32> to vector<8xf32>
    %90 = vector.shape_cast %89 : vector<8xf32> to vector<8x1xf32>
    %91 = arith.addf %88, %90 : vector<8x1xf32>
    %92 = vector.broadcast %84 : vector<8x1xf32> to vector<8x4xf32>
    %93 = arith.mulf %92, %28 : vector<8x4xf32>
    %cst_38 = arith.constant dense<0.000000e+00> : vector<8x4xf32>
    %94 = tpu.matmul %87, %78, %cst_38 {dimension_numbers = #tpu.dot_dimension_numbers<[1], [0], [0], [1], [0, 0, 1, 1], [], []>} : vector<8x8xf32>, vector<8x4xf32>, vector<8x4xf32> -> vector<8x4xf32>
    %95 = arith.addf %93, %94 : vector<8x4xf32>
    %96 = vector.extract_strided_slice %38 {offsets = [0, 12], sizes = [8, 4], strides = [1, 1]} : vector<8x64xf32> to vector<8x4xf32>
    %97 = vector.extract_strided_slice %38 {offsets = [0, 44], sizes = [8, 4], strides = [1, 1]} : vector<8x64xf32> to vector<8x4xf32>
    %cst_39 = arith.constant dense<0.000000e+00> : vector<8x8xf32>
    %98 = tpu.matmul %5, %96, %cst_39 {dimension_numbers = #tpu.dot_dimension_numbers<[1], [1], [0], [0], [0, 0, 1, 0], [], []>} : vector<8x4xf32>, vector<8x4xf32>, vector<8x8xf32> -> vector<8x8xf32>
    %cst_40 = arith.constant dense<0xFF800000> : vector<8xf32>
    %99 = vector.multi_reduction <maximumf>, %98, %cst_40 [1] : vector<8x8xf32> to vector<8xf32>
    %100 = vector.shape_cast %99 : vector<8xf32> to vector<8x1xf32>
    %101 = arith.maximumf %13, %100 : vector<8x1xf32>
    %102 = arith.subf %13, %101 : vector<8x1xf32>
    %103 = math.exp %102 : vector<8x1xf32>
    %104 = vector.broadcast %101 : vector<8x1xf32> to vector<8x8xf32>
    %105 = arith.subf %98, %104 : vector<8x8xf32>
    %106 = math.exp %105 : vector<8x8xf32>
    %107 = arith.mulf %103, %21 : vector<8x1xf32>
    %cst_41 = arith.constant dense<0.000000e+00> : vector<8xf32>
    %108 = vector.multi_reduction <add>, %106, %cst_41 [1] : vector<8x8xf32> to vector<8xf32>
    %109 = vector.shape_cast %108 : vector<8xf32> to vector<8x1xf32>
    %110 = arith.addf %107, %109 : vector<8x1xf32>
    %111 = vector.broadcast %103 : vector<8x1xf32> to vector<8x4xf32>
    %112 = arith.mulf %111, %29 : vector<8x4xf32>
    %cst_42 = arith.constant dense<0.000000e+00> : vector<8x4xf32>
    %113 = tpu.matmul %106, %97, %cst_42 {dimension_numbers = #tpu.dot_dimension_numbers<[1], [0], [0], [1], [0, 0, 1, 1], [], []>} : vector<8x8xf32>, vector<8x4xf32>, vector<8x4xf32> -> vector<8x4xf32>
    %114 = arith.addf %112, %113 : vector<8x4xf32>
    %115 = vector.extract_strided_slice %38 {offsets = [0, 16], sizes = [8, 4], strides = [1, 1]} : vector<8x64xf32> to vector<8x4xf32>
    %116 = vector.extract_strided_slice %38 {offsets = [0, 48], sizes = [8, 4], strides = [1, 1]} : vector<8x64xf32> to vector<8x4xf32>
    %cst_43 = arith.constant dense<0.000000e+00> : vector<8x8xf32>
    %117 = tpu.matmul %6, %115, %cst_43 {dimension_numbers = #tpu.dot_dimension_numbers<[1], [1], [0], [0], [0, 0, 1, 0], [], []>} : vector<8x4xf32>, vector<8x4xf32>, vector<8x8xf32> -> vector<8x8xf32>
    %cst_44 = arith.constant dense<0xFF800000> : vector<8xf32>
    %118 = vector.multi_reduction <maximumf>, %117, %cst_44 [1] : vector<8x8xf32> to vector<8xf32>
    %119 = vector.shape_cast %118 : vector<8xf32> to vector<8x1xf32>
    %120 = arith.maximumf %14, %119 : vector<8x1xf32>
    %121 = arith.subf %14, %120 : vector<8x1xf32>
    %122 = math.exp %121 : vector<8x1xf32>
    %123 = vector.broadcast %120 : vector<8x1xf32> to vector<8x8xf32>
    %124 = arith.subf %117, %123 : vector<8x8xf32>
    %125 = math.exp %124 : vector<8x8xf32>
    %126 = arith.mulf %122, %22 : vector<8x1xf32>
    %cst_45 = arith.constant dense<0.000000e+00> : vector<8xf32>
    %127 = vector.multi_reduction <add>, %125, %cst_45 [1] : vector<8x8xf32> to vector<8xf32>
    %128 = vector.shape_cast %127 : vector<8xf32> to vector<8x1xf32>
    %129 = arith.addf %126, %128 : vector<8x1xf32>
    %130 = vector.broadcast %122 : vector<8x1xf32> to vector<8x4xf32>
    %131 = arith.mulf %130, %30 : vector<8x4xf32>
    %cst_46 = arith.constant dense<0.000000e+00> : vector<8x4xf32>
    %132 = tpu.matmul %125, %116, %cst_46 {dimension_numbers = #tpu.dot_dimension_numbers<[1], [0], [0], [1], [0, 0, 1, 1], [], []>} : vector<8x8xf32>, vector<8x4xf32>, vector<8x4xf32> -> vector<8x4xf32>
    %133 = arith.addf %131, %132 : vector<8x4xf32>
    %134 = vector.extract_strided_slice %38 {offsets = [0, 20], sizes = [8, 4], strides = [1, 1]} : vector<8x64xf32> to vector<8x4xf32>
    %135 = vector.extract_strided_slice %38 {offsets = [0, 52], sizes = [8, 4], strides = [1, 1]} : vector<8x64xf32> to vector<8x4xf32>
    %cst_47 = arith.constant dense<0.000000e+00> : vector<8x8xf32>
    %136 = tpu.matmul %7, %134, %cst_47 {dimension_numbers = #tpu.dot_dimension_numbers<[1], [1], [0], [0], [0, 0, 1, 0], [], []>} : vector<8x4xf32>, vector<8x4xf32>, vector<8x8xf32> -> vector<8x8xf32>
    %cst_48 = arith.constant dense<0xFF800000> : vector<8xf32>
    %137 = vector.multi_reduction <maximumf>, %136, %cst_48 [1] : vector<8x8xf32> to vector<8xf32>
    %138 = vector.shape_cast %137 : vector<8xf32> to vector<8x1xf32>
    %139 = arith.maximumf %15, %138 : vector<8x1xf32>
    %140 = arith.subf %15, %139 : vector<8x1xf32>
    %141 = math.exp %140 : vector<8x1xf32>
    %142 = vector.broadcast %139 : vector<8x1xf32> to vector<8x8xf32>
    %143 = arith.subf %136, %142 : vector<8x8xf32>
    %144 = math.exp %143 : vector<8x8xf32>
    %145 = arith.mulf %141, %23 : vector<8x1xf32>
    %cst_49 = arith.constant dense<0.000000e+00> : vector<8xf32>
    %146 = vector.multi_reduction <add>, %144, %cst_49 [1] : vector<8x8xf32> to vector<8xf32>
    %147 = vector.shape_cast %146 : vector<8xf32> to vector<8x1xf32>
    %148 = arith.addf %145, %147 : vector<8x1xf32>
    %149 = vector.broadcast %141 : vector<8x1xf32> to vector<8x4xf32>
    %150 = arith.mulf %149, %31 : vector<8x4xf32>
    %cst_50 = arith.constant dense<0.000000e+00> : vector<8x4xf32>
    %151 = tpu.matmul %144, %135, %cst_50 {dimension_numbers = #tpu.dot_dimension_numbers<[1], [0], [0], [1], [0, 0, 1, 1], [], []>} : vector<8x8xf32>, vector<8x4xf32>, vector<8x4xf32> -> vector<8x4xf32>
    %152 = arith.addf %150, %151 : vector<8x4xf32>
    %153 = vector.extract_strided_slice %38 {offsets = [0, 24], sizes = [8, 4], strides = [1, 1]} : vector<8x64xf32> to vector<8x4xf32>
    %154 = vector.extract_strided_slice %38 {offsets = [0, 56], sizes = [8, 4], strides = [1, 1]} : vector<8x64xf32> to vector<8x4xf32>
    %cst_51 = arith.constant dense<0.000000e+00> : vector<8x8xf32>
    %155 = tpu.matmul %8, %153, %cst_51 {dimension_numbers = #tpu.dot_dimension_numbers<[1], [1], [0], [0], [0, 0, 1, 0], [], []>} : vector<8x4xf32>, vector<8x4xf32>, vector<8x8xf32> -> vector<8x8xf32>
    %cst_52 = arith.constant dense<0xFF800000> : vector<8xf32>
    %156 = vector.multi_reduction <maximumf>, %155, %cst_52 [1] : vector<8x8xf32> to vector<8xf32>
    %157 = vector.shape_cast %156 : vector<8xf32> to vector<8x1xf32>
    %158 = arith.maximumf %16, %157 : vector<8x1xf32>
    %159 = arith.subf %16, %158 : vector<8x1xf32>
    %160 = math.exp %159 : vector<8x1xf32>
    %161 = vector.broadcast %158 : vector<8x1xf32> to vector<8x8xf32>
    %162 = arith.subf %155, %161 : vector<8x8xf32>
    %163 = math.exp %162 : vector<8x8xf32>
    %164 = arith.mulf %160, %24 : vector<8x1xf32>
    %cst_53 = arith.constant dense<0.000000e+00> : vector<8xf32>
    %165 = vector.multi_reduction <add>, %163, %cst_53 [1] : vector<8x8xf32> to vector<8xf32>
    %166 = vector.shape_cast %165 : vector<8xf32> to vector<8x1xf32>
    %167 = arith.addf %164, %166 : vector<8x1xf32>
    %168 = vector.broadcast %160 : vector<8x1xf32> to vector<8x4xf32>
    %169 = arith.mulf %168, %32 : vector<8x4xf32>
    %cst_54 = arith.constant dense<0.000000e+00> : vector<8x4xf32>
    %170 = tpu.matmul %163, %154, %cst_54 {dimension_numbers = #tpu.dot_dimension_numbers<[1], [0], [0], [1], [0, 0, 1, 1], [], []>} : vector<8x8xf32>, vector<8x4xf32>, vector<8x4xf32> -> vector<8x4xf32>
    %171 = arith.addf %169, %170 : vector<8x4xf32>
    %172 = vector.extract_strided_slice %38 {offsets = [0, 28], sizes = [8, 4], strides = [1, 1]} : vector<8x64xf32> to vector<8x4xf32>
    %173 = vector.extract_strided_slice %38 {offsets = [0, 60], sizes = [8, 4], strides = [1, 1]} : vector<8x64xf32> to vector<8x4xf32>
    %cst_55 = arith.constant dense<0.000000e+00> : vector<8x8xf32>
    %174 = tpu.matmul %9, %172, %cst_55 {dimension_numbers = #tpu.dot_dimension_numbers<[1], [1], [0], [0], [0, 0, 1, 0], [], []>} : vector<8x4xf32>, vector<8x4xf32>, vector<8x8xf32> -> vector<8x8xf32>
    %cst_56 = arith.constant dense<0xFF800000> : vector<8xf32>
    %175 = vector.multi_reduction <maximumf>, %174, %cst_56 [1] : vector<8x8xf32> to vector<8xf32>
    %176 = vector.shape_cast %175 : vector<8xf32> to vector<8x1xf32>
    %177 = arith.maximumf %17, %176 : vector<8x1xf32>
    %178 = arith.subf %17, %177 : vector<8x1xf32>
    %179 = math.exp %178 : vector<8x1xf32>
    %180 = vector.broadcast %177 : vector<8x1xf32> to vector<8x8xf32>
    %181 = arith.subf %174, %180 : vector<8x8xf32>
    %182 = math.exp %181 : vector<8x8xf32>
    %183 = arith.mulf %179, %25 : vector<8x1xf32>
    %cst_57 = arith.constant dense<0.000000e+00> : vector<8xf32>
    %184 = vector.multi_reduction <add>, %182, %cst_57 [1] : vector<8x8xf32> to vector<8xf32>
    %185 = vector.shape_cast %184 : vector<8xf32> to vector<8x1xf32>
    %186 = arith.addf %183, %185 : vector<8x1xf32>
    %187 = vector.broadcast %179 : vector<8x1xf32> to vector<8x4xf32>
    %188 = arith.mulf %187, %33 : vector<8x4xf32>
    %cst_58 = arith.constant dense<0.000000e+00> : vector<8x4xf32>
    %189 = tpu.matmul %182, %173, %cst_58 {dimension_numbers = #tpu.dot_dimension_numbers<[1], [0], [0], [1], [0, 0, 1, 1], [], []>} : vector<8x8xf32>, vector<8x4xf32>, vector<8x4xf32> -> vector<8x4xf32>
    %190 = arith.addf %188, %189 : vector<8x4xf32>
    %c1_i32 = arith.constant 1 : i32
    %191 = tpu.reciprocal %53 {approx = true} : vector<8x1xf32> -> vector<8x1xf32>
    %192 = arith.mulf %53, %191 : vector<8x1xf32>
    %cst_59 = arith.constant 2.000000e+00 : f32
    %193 = vector.broadcast %cst_59 : f32 to vector<8x1xf32>
    %194 = arith.subf %193, %192 : vector<8x1xf32>
    %195 = arith.mulf %191, %194 : vector<8x1xf32>
    %196 = vector.broadcast %195 : vector<8x1xf32> to vector<8x4xf32>
    %197 = arith.mulf %57, %196 : vector<8x4xf32>
    %198 = tpu.reciprocal %72 {approx = true} : vector<8x1xf32> -> vector<8x1xf32>
    %199 = arith.mulf %72, %198 : vector<8x1xf32>
    %cst_60 = arith.constant 2.000000e+00 : f32
    %200 = vector.broadcast %cst_60 : f32 to vector<8x1xf32>
    %201 = arith.subf %200, %199 : vector<8x1xf32>
    %202 = arith.mulf %198, %201 : vector<8x1xf32>
    %203 = vector.broadcast %202 : vector<8x1xf32> to vector<8x4xf32>
    %204 = arith.mulf %76, %203 : vector<8x4xf32>
    %205 = tpu.reciprocal %91 {approx = true} : vector<8x1xf32> -> vector<8x1xf32>
    %206 = arith.mulf %91, %205 : vector<8x1xf32>
    %cst_61 = arith.constant 2.000000e+00 : f32
    %207 = vector.broadcast %cst_61 : f32 to vector<8x1xf32>
    %208 = arith.subf %207, %206 : vector<8x1xf32>
    %209 = arith.mulf %205, %208 : vector<8x1xf32>
    %210 = vector.broadcast %209 : vector<8x1xf32> to vector<8x4xf32>
    %211 = arith.mulf %95, %210 : vector<8x4xf32>
    %212 = tpu.reciprocal %110 {approx = true} : vector<8x1xf32> -> vector<8x1xf32>
    %213 = arith.mulf %110, %212 : vector<8x1xf32>
    %cst_62 = arith.constant 2.000000e+00 : f32
    %214 = vector.broadcast %cst_62 : f32 to vector<8x1xf32>
    %215 = arith.subf %214, %213 : vector<8x1xf32>
    %216 = arith.mulf %212, %215 : vector<8x1xf32>
    %217 = vector.broadcast %216 : vector<8x1xf32> to vector<8x4xf32>
    %218 = arith.mulf %114, %217 : vector<8x4xf32>
    %219 = tpu.reciprocal %129 {approx = true} : vector<8x1xf32> -> vector<8x1xf32>
    %220 = arith.mulf %129, %219 : vector<8x1xf32>
    %cst_63 = arith.constant 2.000000e+00 : f32
    %221 = vector.broadcast %cst_63 : f32 to vector<8x1xf32>
    %222 = arith.subf %221, %220 : vector<8x1xf32>
    %223 = arith.mulf %219, %222 : vector<8x1xf32>
    %224 = vector.broadcast %223 : vector<8x1xf32> to vector<8x4xf32>
    %225 = arith.mulf %133, %224 : vector<8x4xf32>
    %226 = tpu.reciprocal %148 {approx = true} : vector<8x1xf32> -> vector<8x1xf32>
    %227 = arith.mulf %148, %226 : vector<8x1xf32>
    %cst_64 = arith.constant 2.000000e+00 : f32
    %228 = vector.broadcast %cst_64 : f32 to vector<8x1xf32>
    %229 = arith.subf %228, %227 : vector<8x1xf32>
    %230 = arith.mulf %226, %229 : vector<8x1xf32>
    %231 = vector.broadcast %230 : vector<8x1xf32> to vector<8x4xf32>
    %232 = arith.mulf %152, %231 : vector<8x4xf32>
    %233 = tpu.reciprocal %167 {approx = true} : vector<8x1xf32> -> vector<8x1xf32>
    %234 = arith.mulf %167, %233 : vector<8x1xf32>
    %cst_65 = arith.constant 2.000000e+00 : f32
    %235 = vector.broadcast %cst_65 : f32 to vector<8x1xf32>
    %236 = arith.subf %235, %234 : vector<8x1xf32>
    %237 = arith.mulf %233, %236 : vector<8x1xf32>
    %238 = vector.broadcast %237 : vector<8x1xf32> to vector<8x4xf32>
    %239 = arith.mulf %171, %238 : vector<8x4xf32>
    %240 = tpu.reciprocal %186 {approx = true} : vector<8x1xf32> -> vector<8x1xf32>
    %241 = arith.mulf %186, %240 : vector<8x1xf32>
    %cst_66 = arith.constant 2.000000e+00 : f32
    %242 = vector.broadcast %cst_66 : f32 to vector<8x1xf32>
    %243 = arith.subf %242, %241 : vector<8x1xf32>
    %244 = arith.mulf %240, %243 : vector<8x1xf32>
    %245 = vector.broadcast %244 : vector<8x1xf32> to vector<8x4xf32>
    %246 = arith.mulf %190, %245 : vector<8x4xf32>
    %247 = tpu.concatenate %197, %204, %211, %218, %225, %232, %239, %246 in 1 : vector<8x4xf32>, vector<8x4xf32>, vector<8x4xf32>, vector<8x4xf32>, vector<8x4xf32>, vector<8x4xf32>, vector<8x4xf32>, vector<8x4xf32> -> vector<8x32xf32>
    %c0_67 = arith.constant 0 : index
    %c0_68 = arith.constant 0 : index
    %248 = vector.load %arg4[%c0_67, %c0_68] : memref<32x32xf32, #tpu.memory_space<vmem>>, vector<32x32xf32>
    %cst_69 = arith.constant dense<0.000000e+00> : vector<8x32xf32>
    %249 = tpu.matmul %247, %248, %cst_69 {dimension_numbers = #tpu.dot_dimension_numbers<[1], [0], [0], [1], [0, 0, 1, 1], [], []>} : vector<8x32xf32>, vector<32x32xf32>, vector<8x32xf32> -> vector<8x32xf32>
    %c0_70 = arith.constant 0 : index
    %c0_71 = arith.constant 0 : index
    %250 = vector.load %arg5[%c0_70, %c0_71] : memref<1x32xf32, #tpu.memory_space<vmem>>, vector<1x32xf32>
    %251 = vector.broadcast %250 : vector<1x32xf32> to vector<8x32xf32>
    %252 = arith.addf %249, %251 : vector<8x32xf32>
    %c0_72 = arith.constant 0 : index
    %c0_73 = arith.constant 0 : index
    %c0_74 = arith.constant 0 : index
    %253 = vector.load %arg6[%c0_72, %c0_73, %c0_74] : memref<1x8x32xf32, #tpu.memory_space<vmem>>, vector<1x8x32xf32>
    %254 = vector.shape_cast %253 : vector<1x8x32xf32> to vector<8x32xf32>
    %255 = vector.shape_cast %252 : vector<8x32xf32> to vector<1x8x32xf32>
    tpu.vector_store %arg6[%c0_72, %c0_73, %c0_74], %255 {strides = array<i32>} : memref<1x8x32xf32, #tpu.memory_space<vmem>>, vector<1x8x32xf32>,
    return
  }
  func.func @transform_0(%arg0: i32, %arg1: i32) -> (i32, i32, i32) {
    %c0_i32 = arith.constant 0 : i32
    %c0_i32_0 = arith.constant 0 : i32
    return %arg0, %arg1, %c0_i32 : i32, i32, i32
  }
  func.func @transform_1(%arg0: i32, %arg1: i32) -> (i32, i32, i32) {
    %c0_i32 = arith.constant 0 : i32
    %c0_i32_0 = arith.constant 0 : i32
    %c0_i32_1 = arith.constant 0 : i32
    return %arg0, %c0_i32, %c0_i32_0 : i32, i32, i32
  }
  func.func @transform_2(%arg0: i32, %arg1: i32) -> (i32, i32) {
    %c0_i32 = arith.constant 0 : i32
    %c0_i32_0 = arith.constant 0 : i32
    %c0_i32_1 = arith.constant 0 : i32
    return %c0_i32, %c0_i32_0 : i32, i32
  }
  func.func @transform_3(%arg0: i32, %arg1: i32) -> (i32, i32) {
    %c0_i32 = arith.constant 0 : i32
    %c0_i32_0 = arith.constant 0 : i32
    %c0_i32_1 = arith.constant 0 : i32
    return %c0_i32, %c0_i32_0 : i32, i32
  }
  func.func @transform_4(%arg0: i32, %arg1: i32) -> (i32, i32, i32) {
    %c0_i32 = arith.constant 0 : i32
    %c0_i32_0 = arith.constant 0 : i32
    return %arg0, %arg1, %c0_i32 : i32, i32, i32
  }
}

</mosaic_0001>

<bundles_post_ra>
// kernel: attention_forward.3
= control target key start
LH: loop header
LB: loop body
LE: loop exit
PB: predicated region body
PF: predicated region fallthrough
CT: control target
= control target key end

     0   :  { %vm15_vm0 = vcmask 261120   ;;  %v151_v3 = vmov 0.0   ;;  %s199_s1 = inlined_call_operand.vmem [shape: f32[32,32], index: 1, kind: input, shape index: {}]   ;;  %s200_s0 = inlined_call_operand.vmem [shape: f32[16,32], index: 0, kind: input, shape index: {}]   ;;  %s201_s2 = inlined_call_operand.vmem [shape: f32[16,32], index: 2, kind: output, shape index: {}]  }
   0x1   :  { %v22_v0 = vld [vmem:[%s199_s1] sm:$0xff]  ;;  %v23_v1 = vld [vmem:[%s199_s1 + $0x8] sm:$0xff]  ;;  %v24_v2 = vld [vmem:[%s199_s1 + $0x10] sm:$0xff]  ;;  %17 = vst.msk [vmem:[#allocation2 + $0x8] sm:$0xff] %vm15_vm0, %v151_v3 }
   0x2   :  { %16 = vst.msk [vmem:[#allocation2] sm:$0xff] %vm15_vm0, %v151_v3  ;;  %v142_v4 = vpack.c.bf16 %v23_v1, %v22_v0  ;;  %v25_v5 = vld [vmem:[%s199_s1 + $0x18] sm:$0xff]  ;;  %v20_v6 = vld [vmem:[%s200_s0] sm:$0xff]  ;;  %v21_v8 = vld [vmem:[%s200_s0 + $0x8] sm:$0xff] }
   0x3   :  { %v146_v7 = vpack.c.bf16 %v25_v5, %v24_v2  ;;  %139 = vmatprep.mubr.msk.f32.mxu0 %vm15_vm0, %v20_v6 }
   0x4   :  { %143 = vmatprep.subr.bf16.mxu0 %v142_v4 }
   0x5   :  { %145 = vmatpush3.bf16.msra.mxu0 %v142_v4 }
   0x6   :  { %147 = vmatprep.subr.bf16.mxu0 %v146_v7 }
   0x8   :  { %v19_v9 = vld [vmem:[#allocation2 + $0x8] sm:$0xff] }
   0x9   :  { %149 = vmatpush3.bf16.msra.mxu0 %v146_v7  ;;  %v18_v10 = vld [vmem:[#allocation2] sm:$0xff] }
   0xc   :  { %140 = vmatmul.mubr.msk.f32.vlgmr.msra.gmra.mrb[0].mxu0 %vm15_vm0, %v21_v8 }
  0xdf   :  { %v141_v11 = vpop.f32.mrb[0].mxu0 }
  0xe0   :  { %v109_v12 = vadd.f32 %v141_v11, %v19_v9  ;;  %v99_v13 = vpop.f32.mrb[1].mxu0 }
  0xe1   :  { %v108_v14 = vadd.f32 %v99_v13, %v18_v10 }
  0xe2   :  { %111 = vst.msk [vmem:[#allocation2 + $0x8] sm:$0xff] %vm15_vm0, %v109_v12 }
  0xe3   :  { %110 = vst.msk [vmem:[#allocation2] sm:$0xff] %vm15_vm0, %v108_v14 }
  0xe9   :  { %v116_v15 = vld [vmem:[#allocation2 + $0x8] sm:$0xff] }
  0xea   :  { %118 = vst.msk [vmem:[%s201_s2 + $0x8] sm:$0xff] %vm15_vm0, %v116_v15  ;;  %v115_v16 = vld [vmem:[#allocation2] sm:$0xff] }
  0xeb   :  { %117 = vst.msk [vmem:[%s201_s2] sm:$0xff] %vm15_vm0, %v115_v16 }

// kernel: attention_forward.4
= control target key start
LH: loop header
LB: loop body
LE: loop exit
PB: predicated region body
PF: predicated region fallthrough
CT: control target
= control target key end

     0   :  { %7 = vsyncpa [#allocation4], 0  ;;  %s290_s0 = inlined_call_operand.hbm [shape: f32[16,32], index: 0, kind: input, shape index: {}]   ;;  %s291_s1 = inlined_call_operand.hbm [shape: f32[32,64], index: 1, kind: input, shape index: {}]   ;;  %s292_s2 = inlined_call_operand.vmem [shape: f32[16,64], index: 2, kind: output, shape index: {}]  }
   0x1   :  { %8 = vsyncpa [#allocation6], 0  ;;  %s234_s9 = smov [#allocation3]   ;;  %s186_s13 = scalar_lea.hbm %s290_s0, 256 }
   0x2   :  { %s14_s10 = sshll.u32 %s234_s9, 4  ;;  %p187_p0 = scmp.ne.s32.totalorder %s290_s0, %s186_s13  ;;  %s15_s10 = int_to_ptr.vmem [resolvable:$true] %s14_s10 }
   0x3   :  { %p190_p1 = scmp.lt.u32.totalorder %s186_s13, %s290_s0 }
   0x5   :  { %p192_p2 = pnand %p190_p1, %p187_p0 }
   0x7   :  { %195 = shalt.err (!%p192_p2)
}
   0x8   :  { %s196_s18 = scalar_lea.vmem %s15_s10, 256  ;;  %p201_p4 = scmp.lt.s32.totalorder %s15_s10, %s15_s10 }
   0x9   :  { %p197_p3 = scmp.ne.s32.totalorder %s15_s10, %s196_s18  ;;  %p202_p5 = scmp.lt.s32.totalorder %s196_s18, %s196_s18 }
   0xb   :  { %p203_p6 = por %p202_p5, %p201_p4 }
   0xd   :  { %p204_p7 = pnand %p203_p6, %p197_p3 }
   0xf   :  { %207 = shalt.err (!%p204_p7)
}
  0x10   :  { %s235_s19 = smov 128   ;;  %s236_s20 = smov 8  }
  0x11   :  { %20 = dma.hbm_to_vmem [thread:$0]  %s290_s0, 256, %s15_s10, [#allocation4], %s235_s19, %s235_s19, %s236_s20  }
  0x12   :  { %s237_s23 = smov [#allocation5]   ;;  %s208_s27 = scalar_lea.hbm %s291_s1, 512 }
  0x13   :  { %s26_s24 = sshll.u32 %s237_s23, 4  ;;  %p209_p8 = scmp.ne.s32.totalorder %s291_s1, %s208_s27  ;;  %s27_s24 = int_to_ptr.vmem [resolvable:$true] %s26_s24 }
  0x14   :  { %p212_p9 = scmp.lt.u32.totalorder %s208_s27, %s291_s1 }
  0x16   :  { %p214_p10 = pnand %p212_p9, %p209_p8 }
  0x18   :  { %217 = shalt.err (!%p214_p10)
}
  0x19   :  { %s218_s4 = scalar_lea.vmem %s27_s24, 512  ;;  %p223_p12 = scmp.lt.s32.totalorder %s27_s24, %s27_s24 }
  0x1a   :  { %p219_p11 = scmp.ne.s32.totalorder %s27_s24, %s218_s4  ;;  %p224_p13 = scmp.lt.s32.totalorder %s218_s4, %s218_s4 }
  0x1c   :  { %p225_p0 = por %p224_p13, %p223_p12 }
  0x1e   :  { %p226_p1 = pnand %p225_p0, %p219_p11 }
  0x20   :  { %229 = shalt.err (!%p226_p1)
}
  0x21   :  { %32 = dma.hbm_to_vmem [thread:$0]  %s291_s1, 512, %s27_s24, [#allocation6], %s235_s19, %s235_s19, %s236_s20  }
  0x22   :  { %230 = dma.done.wait [#allocation4], 256  }
  0x23   :  { %231 = vsyncadd [#allocation4], 4294967040 }
  0x24   :  { %232 = dma.done.wait [#allocation6], 512  }
  0x25   :  { %233 = vsyncadd [#allocation6], 4294966784  ;;  %vm43_vm0 = vcmask 523264   ;;  %v238_v0 = vmov 0.0   ;;  %vm54_vm1 = vcmask 261120   ;;  %v50_v1 = vld [vmem:[#allocation5] sm:$0xff] }
  0x26   :  { %45 = vst.msk [vmem:[#allocation2 + $0x8] sm:$0xff] %vm43_vm0, %v238_v0  ;;  %44 = vst.msk [vmem:[#allocation2] sm:$0xff] %vm43_vm0, %v238_v0  ;;  %v51_v2 = vld [vmem:[#allocation5 + $0x8] sm:$0xff]  ;;  %v52_v3 = vld [vmem:[#allocation5 + $0x10] sm:$0xff] }
  0x27   :  { %v173_v4 = vpack.c.bf16 %v51_v2, %v50_v1  ;;  %v53_v5 = vld [vmem:[#allocation5 + $0x18] sm:$0xff]  ;;  %v48_v6 = vld [vmem:[#allocation3] sm:$0xff] }
  0x28   :  { %v177_v7 = vpack.c.bf16 %v53_v5, %v52_v3  ;;  %170 = vmatprep.mubr.msk.f32.mxu0 %vm54_vm1, %v48_v6  ;;  %v49_v8 = vld [vmem:[#allocation3 + $0x8] sm:$0xff] }
  0x29   :  { %174 = vmatprep.subr.bf16.mxu0 %v173_v4 }
  0x2a   :  { %176 = vmatpush3.bf16.msra.mxu0 %v173_v4 }
  0x2b   :  { %178 = vmatprep.subr.bf16.mxu0 %v177_v7 }
  0x2d   :  { %v47_v9 = vld [vmem:[#allocation2 + $0x8] sm:$0xff]  ;;  %v46_v10 = vld [vmem:[#allocation2] sm:$0xff] }
  0x2e   :  { %180 = vmatpush3.bf16.msra.mxu0 %v177_v7 }
  0x31   :  { %171 = vmatmul.mubr.msk.f32.vlgmr.msra.gmra.mrb[0].mxu0 %vm54_vm1, %v49_v8 }
 0x104   :  { %v172_v11 = vpop.f32.mrb[0].mxu0 }
 0x105   :  { %v137_v12 = vadd.f32 %v172_v11, %v47_v9  ;;  %v127_v13 = vpop.f32.mrb[1].mxu0 }
 0x106   :  { %v136_v14 = vadd.f32 %v127_v13, %v46_v10 }
 0x107   :  { %140 = vst.msk [vmem:[#allocation2 + $0x8] sm:$0xff] %vm43_vm0, %v137_v12 }
 0x108   :  { %139 = vst.msk [vmem:[#allocation2] sm:$0xff] %vm43_vm0, %v136_v14 }
 0x10e   :  { %v145_v15 = vld [vmem:[#allocation2 + $0x8] sm:$0xff] }
 0x10f   :  { %147 = vst.msk [vmem:[%s292_s2 + $0x8] sm:$0xff] %vm43_vm0, %v145_v15  ;;  %v144_v16 = vld [vmem:[#allocation2] sm:$0xff] }
 0x110   :  { %146 = vst.msk [vmem:[%s292_s2] sm:$0xff] %vm43_vm0, %v144_v16 }
 0x111   :  { %152 = vsyncpa [#allocation4], 1 }
 0x112   :  { %153 = vsyncpa [#allocation6], 1 }

// kernel: attention_forward.5
= control target key start
LH: loop header
LB: loop body
LE: loop exit
PB: predicated region body
PF: predicated region fallthrough
CT: control target
= control target key end

     0   :  { %9 = vsyncpa [#allocation3], 0  ;;  %s2576_s0 = inlined_call_operand.vmem [shape: f32[2,8,32], index: 0, kind: input, shape index: {}]   ;;  %s2577_s1 = inlined_call_operand.vmem [shape: f32[2,8,64], index: 1, kind: input, shape index: {}]   ;;  %s2578_s2 = inlined_call_operand.vmem [shape: f32[32,32], index: 2, kind: input, shape index: {}]   ;;  %s2579_s3 = inlined_call_operand.vmem [shape: f32[1,32], index: 3, kind: input, shape index: {}]   ;;  %s2580_s4 = inlined_call_operand.hbm [shape: f32[2,8,32], index: 4, kind: output, shape index: {}]  }
   0x1   :  { %11 = vsyncpa [#allocation3 + $0x1], 0  ;;  %s2284_s15 = smov 0   ;;  %s2286_s16 = smov 0  }
   0x2   :  { %s2288_s17 = smov 0   ;;  %s2290_s18 = smov 0  }
   0x3   :  { %s2292_s19 = smov 0   ;;  %s2294_s20 = smov 0  }
   0x4 LB: > { %s1853_s21 = sadd.s32 4294967295, %s2231_s20   ;;  %s1854_s22 = sadd.s32 4294967294, %s2231_s20   ;;  %s2231_s20 = sphi %s2294_s20, %s17_s20   ;;  %s2227_s19 = sphi %s2292_s19, %s2587_s19   ;;  %s2223_s18 = sphi %s2290_s18, %s2586_s18   ;;  %s2219_s17 = sphi %s2288_s17, %s2585_s17   ;;  %s2215_s16 = sphi %s2286_s16, %s2584_s16   ;;  %s2211_s15 = sphi %s2284_s15, %s2583_s15  }
   0x5   : > { %s29_s23 = sadd.s32 1, %s2227_s19  ;;  %s134_s24 = sadd.s32 1, %s2219_s17 }
   0x6   : > { %p31_p0 = scmp.ge.s32.totalorder %s29_s23, 2  ;;  %p144_p1 = scmp.ne.s32.totalorder %s2219_s17, %s2215_s16 }
   0x7   : > { %p145_p2 = scmp.eq.s32.totalorder %s1853_s21, 1  ;;  %p150_p3 = scmp.ne.s32.totalorder %s2215_s16, %s2211_s15 }
   0x8   : > { %s2589_s23 = smov (%p31_p0, %s29_s23), 0  ;;  %p151_p5 = scmp.eq.s32.totalorder %s1854_s22, 1 }
   0x9   : > { %p2324_p4 = por %p145_p2, %p144_p1  ;;  %s129_s26 = ssub.s32 %s2227_s19, %s2589_s23 }
   0xa   : > { %p1857_p6 = scmp.ge.s32.totalorder %s2231_s20, 1  ;;  %p132_p7 = scmp.eq.s32.totalorder %s129_s26, 0 }
   0xb   : > { %p2331_p8 = por %p151_p5, %p150_p3  ;;  %p192_p9 = scmp.lt.s32.totalorder %s2231_s20, 3 }
   0xc   : > { %s2337_s28 = scalar_select %p132_p7, %s2219_s17, %s134_s24  }
   0xd   : > { %p193_p10 = pnand %p1857_p6, %p192_p9 }
   0xe   : > { %p224_p11 = scmp.lt.s32.totalorder (!%p193_p10), %s2223_s18, 1  ;;  %v2233_v0 = vmov (!%p193_p10), 0.0   ;;  %vm2234_vm0 = vmmov (!%p193_p10), 0   ;;  %vm237_vm1 = vcmask (!%p193_p10), 31744   ;;  %s2235_s11 = smov (!%p193_p10), 124   ;;  %vm314_vm2 = vcmask (!%p193_p10), 64512  }
   0xf   : > { %196 = sbr.rel (%p193_p10) target bundleno = 1145 (0x479), region = 36  ;;  %1928 = vmatprep.subr.mxu0 (!%p193_p10), %v2233_v0  ;;  %1930 = vmatprep.mubr.msk.f32.mxu0 (!%p193_p10), %vm2234_vm0, %v2233_v0  ;;  %s2236_s12 = smov (!%p193_p10), 120   ;;  %vm1659_vm3 = vcmask (!%p193_p10), 97280   ;;  %vm1661_vm4 = vcmask (!%p193_p10), 130048   ;;  %vm1663_vm5 = vcmask (!%p193_p10), 162816   ;;  %vm1665_vm6 = vcmask (!%p193_p10), 195584  }
  0x10   : > { %1938 = vmatprep.subr.mxu1 (!%p193_p10), %v2233_v0  ;;  %1940 = vmatprep.mubr.msk.f32.mxu1 (!%p193_p10), %vm2234_vm0, %v2233_v0  ;;  %s2237_s13 = smov (!%p193_p10), 116   ;;  %s2238_s14 = smov (!%p193_p10), 112   ;;  %vm1667_vm7 = vcmask (!%p193_p10), 228352   ;;  %vm1680_vm8 = vcmask (!%p193_p10), 261120  }
  0x11   : > { %s2239_s21 = smov (!%p193_p10), 108   ;;  %s2240_s22 = smov (!%p193_p10), 104  }
  0x12   : > { %s2241_s24 = smov (!%p193_p10), 100   ;;  %s2242_s26 = smov (!%p193_p10), 96  }
  0x13   : > { %s2245_s5 = smov (!%p193_p10), 88   ;;  %s2246_s6 = smov (!%p193_p10), 76  }
  0x14   : > { %s2248_s8 = smov (!%p193_p10), 72   ;;  %s2249_s9 = smov (!%p193_p10), 68  }
  0x16   : > { %s225_s29 = scalar_select %p224_p11, %s2223_s18, 1 }
  0x18   : > { %s1859_s30 = sshll.u32 %s225_s29, 3  ;;  %s2243_s29 = smov 92  }
  0x19   : > { %s234_s7 = scalar_lea.vmem %s2577_s1, %s1859_s30  ;;  %s230_s10 = scalar_lea.vmem %s2576_s0, %s1859_s30 }
  0x1a   : > { %v2353_v1 = vld [vmem:[%s234_s7] sm:$0xff]  ;;  %s2244_s30 = smov 84   ;;  %s2247_s7 = smov 80  }
  0x1b   : > { %408 = vrot.lane.b32.xlu0 %v2353_v1, %s2235_s11  ;;  %1929 = vmatpush3.xpose.msk.msra.mxu0 %vm237_vm1, %v2353_v1  ;;  %v235_v2 = vld [vmem:[%s230_s10] sm:$0xff]  ;;  %s2250_s10 = smov 4  }
  0x1c   : > { %577 = vrot.lane.b32.xlu1 %v2353_v1, %s2236_s12  ;;  %1933 = vmatprep.subr.mxu0 %v2233_v0 }
  0x1e   : > { %1931 = vmatmul.mubr.msk.f32.vlgmr.msra.gmra.mrb[0].mxu0 %vm237_vm1, %v235_v2 }
  0x1f   : > { %406 = vrot.lane.b32.xlu0 %v235_v2, %s2235_s11  ;;  %1935 = vmatprep.mubr.msk.f32.mxu0 %vm2234_vm0, %v2233_v0 }
  0x20   : > { %575 = vrot.lane.b32.xlu1 %v235_v2, %s2236_s12 }
  0x23   : > { %746 = vrot.lane.b32.xlu0 %v2353_v1, %s2237_s13 }
  0x24   : > { %744 = vrot.lane.b32.xlu1 %v235_v2, %s2237_s13  ;;  %s1888_s13 = sshll.u32 %s2223_s18, 7  ;;  %s2258_s18 = smov [#allocation2]  }
  0x27   : > { %915 = vrot.lane.b32.xlu0 %v2353_v1, %s2238_s14 }
  0x28   : > { %913 = vrot.lane.b32.xlu1 %v235_v2, %s2238_s14 }
  0x2b   : > { %1084 = vrot.lane.b32.xlu0 %v2353_v1, %s2239_s21 }
  0x2c   : > { %1082 = vrot.lane.b32.xlu1 %v235_v2, %s2239_s21  ;;  %s2251_s21 = smov 8  }
  0x2f   : > { %1253 = vrot.lane.b32.xlu0 %v2353_v1, %s2240_s22 }
  0x30   : > { %1251 = vrot.lane.b32.xlu1 %v235_v2, %s2240_s22  ;;  %s2253_s22 = smov 12  }
  0x33   : > { %1422 = vrot.lane.b32.xlu0 %v2353_v1, %s2241_s24 }
  0x34   : > { %1420 = vrot.lane.b32.xlu1 %v235_v2, %s2241_s24  ;;  %s2254_s24 = smov 16  }
  0x37   : > { %329 = vrot.lane.b32.xlu0 %v2353_v1, %s2242_s26  ;;  %s2255_s26 = smov 20  }
  0x38   : > { %498 = vrot.lane.b32.xlu1 %v2353_v1, %s2243_s29 }
  0x3c   : > { %836 = vrot.lane.b32.xlu1 %v2353_v1, %s2244_s30 }
  0x8d   : > { %v409_v3 = vpop.permute.xlu0 %408 }
  0x8e   : > { %1939 = vmatpush3.xpose.msk.msra.mxu1 %vm237_vm1, %v409_v3  ;;  %v578_v4 = vpop.permute.xlu1 %577 }
  0x8f   : > { %1948 = vmatprep.subr.mxu1 %v2233_v0 }
  0x91   : > { %v407_v5 = vpop.permute.xlu0 %406 }
  0x92   : > { %1941 = vmatmul.mubr.msk.f32.vlgmr.msra.gmra.mrb[0].mxu1 %vm237_vm1, %v407_v5  ;;  %v576_v6 = vpop.permute.xlu1 %575 }
  0x93   : > { %1949 = vmatpush3.xpose.msk.msra.mxu1 %vm237_vm1, %v578_v4  ;;  %1950 = vmatprep.mubr.msk.f32.mxu1 %vm2234_vm0, %v2233_v0 }
  0x94   : > { %1958 = vmatprep.subr.mxu1 %v2233_v0 }
  0x95   : > { %v747_v7 = vpop.permute.xlu0 %746 }
  0x96   : > { %1951 = vmatmul.mubr.msk.f32.vlgmr.msra.gmra.mrb[2].mxu1 %vm237_vm1, %v576_v6  ;;  %v745_v8 = vpop.permute.xlu1 %744 }
  0x97   : > { %1959 = vmatpush3.xpose.msk.msra.mxu1 %vm237_vm1, %v747_v7  ;;  %1960 = vmatprep.mubr.msk.f32.mxu1 %vm2234_vm0, %v2233_v0 }
  0x98   : > { %1968 = vmatprep.subr.mxu1 %v2233_v0 }
  0x99   : > { %v916_v9 = vpop.permute.xlu0 %915 }
  0x9a   : > { %1961 = vmatmul.mubr.msk.f32.vlgmr.msra.gmra.mrb[4].mxu1 %vm237_vm1, %v745_v8  ;;  %v914_v10 = vpop.permute.xlu1 %913 }
  0x9b   : > { %1969 = vmatpush3.xpose.msk.msra.mxu1 %vm237_vm1, %v916_v9  ;;  %1970 = vmatprep.mubr.msk.f32.mxu1 %vm2234_vm0, %v2233_v0 }
  0x9c   : > { %1978 = vmatprep.subr.mxu1 %v2233_v0 }
  0x9d   : > { %v1085_v11 = vpop.permute.xlu0 %1084 }
  0x9e   : > { %1971 = vmatmul.mubr.msk.f32.vlgmr.msra.gmra.mrb[6].mxu1 %vm237_vm1, %v914_v10  ;;  %v1083_v12 = vpop.permute.xlu1 %1082 }
  0x9f   : > { %1979 = vmatpush3.xpose.msk.msra.mxu1 %vm237_vm1, %v1085_v11  ;;  %1980 = vmatprep.mubr.msk.f32.mxu1 %vm2234_vm0, %v2233_v0 }
  0xa0   : > { %1988 = vmatprep.subr.mxu1 %v2233_v0 }
  0xa1   : > { %v1254_v13 = vpop.permute.xlu0 %1253 }
  0xa2   : > { %1981 = vmatmul.mubr.msk.f32.vlgmr.msra.gmra.mrb[8].mxu1 %vm237_vm1, %v1083_v12  ;;  %v1252_v14 = vpop.permute.xlu1 %1251 }
  0xa3   : > { %1989 = vmatpush3.xpose.msk.msra.mxu1 %vm237_vm1, %v1254_v13  ;;  %1990 = vmatprep.mubr.msk.f32.mxu1 %vm2234_vm0, %v2233_v0 }
  0xa4   : > { %1998 = vmatprep.subr.mxu1 %v2233_v0 }
  0xa5   : > { %v1423_v15 = vpop.permute.xlu0 %1422 }
  0xa6   : > { %1991 = vmatmul.mubr.msk.f32.vlgmr.msra.gmra.mrb[10].mxu1 %vm237_vm1, %v1252_v14  ;;  %v1421_v16 = vpop.permute.xlu1 %1420 }
  0xa7   : > { %1999 = vmatpush3.xpose.msk.msra.mxu1 %vm237_vm1, %v1423_v15  ;;  %2000 = vmatprep.mubr.msk.f32.mxu1 %vm2234_vm0, %v2233_v0 }
  0xa9   : > { %v330_v20 = vpop.permute.xlu0 %329 }
  0xaa   : > { %2001 = vmatmul.mubr.msk.f32.vlgmr.msra.gmra.mrb[12].mxu1 %vm237_vm1, %v1421_v16  ;;  %1934 = vmatpush3.msra.mxu0 %v330_v20  ;;  %v499_v43 = vpop.permute.xlu1 %498 }
  0xab   : > { %2016 = vmatprep.mubr.msk.f32.mxu1 %vm2234_vm0, %v2233_v0  ;;  %1943 = vmatprep.subr.mxu0 %v2233_v0 }
  0xae   : > { %v837_v47 = vpop.permute.xlu1 %836 }
  0xf1   : > { %v310_v17 = vpop.f32.mrb[0].mxu0 }
  0xf2   : > { %v315_v18 = vsel %vm314_vm2, %v310_v17, -inf  ;;  %v1932_v19 = vpop.f32.mrb[1].mxu0 }
  0xf3   : > { %316 = vmax.xlane.f32.xlu0 %v315_v18 }
 0x109   : > { %667 = vrot.lane.b32.xlu0 %v2353_v1, %s2245_s5  ;;  %s2157_s5 = sshll.u32 %s2258_s18, 4  ;;  %s2158_s5 = int_to_ptr.vmem [resolvable:$false] %s2157_s5 }
 0x165   : > { %v480_v21 = vpop.f32.mrb[0].mxu1 }
 0x166   : > { %v1942_v22 = vpop.f32.mrb[1].mxu1  ;;  %v484_v23 = vsel %vm314_vm2, %v480_v21, -inf }
 0x167   : > { %485 = vmax.xlane.f32.xlu1 %v484_v23 }
 0x169   : > { %v649_v24 = vpop.f32.mrb[2].mxu1 }
 0x16a   : > { %v1952_v25 = vpop.f32.mrb[3].mxu1  ;;  %v653_v26 = vsel %vm314_vm2, %v649_v24, -inf }
 0x16b   : > { %654 = vmax.xlane.f32.xlu0 %v653_v26 }
 0x16d   : > { %v818_v27 = vpop.f32.mrb[4].mxu1 }
 0x16e   : > { %v1962_v28 = vpop.f32.mrb[5].mxu1  ;;  %v822_v29 = vsel %vm314_vm2, %v818_v27, -inf }
 0x16f   : > { %823 = vmax.xlane.f32.xlu0 %v822_v29 }
 0x171   : > { %v987_v30 = vpop.f32.mrb[6].mxu1 }
 0x172   : > { %v1972_v31 = vpop.f32.mrb[7].mxu1  ;;  %v991_v32 = vsel %vm314_vm2, %v987_v30, -inf }
 0x173   : > { %992 = vmax.xlane.f32.xlu1 %v991_v32 }
 0x175   : > { %v1156_v33 = vpop.f32.mrb[8].mxu1 }
 0x176   : > { %v1160_v34 = vsel %vm314_vm2, %v1156_v33, -inf  ;;  %v1982_v35 = vpop.f32.mrb[9].mxu1 }
 0x177   : > { %1161 = vmax.xlane.f32.xlu0 %v1160_v34 }
 0x179   : > { %v2413_v36 = vpop.f32.mrb[10].mxu1 }
 0x17a   : > { %v1992_v37 = vpop.f32.mrb[11].mxu1  ;;  %v1329_v45 = vsel %vm314_vm2, %v2413_v36, -inf }
 0x17d   : > { %v2415_v38 = vpop.f32.mrb[12].mxu1 }
 0x17e   : > { %v2002_v39 = vpop.f32.mrb[13].mxu1  ;;  %v1498_v46 = vsel %vm314_vm2, %v2415_v38, -inf }
 0x180   : > { %v2417_v40 = vpop.xlane.xlu0 %316 }
 0x181   : > { %v321_v41 = vsub.f32 %v310_v17, %v2417_v40  ;;  %v318_v26 = vsub.f32 -inf, %v2417_v40 }
 0x183   : > { %v322_v42 = vmul.f32 1.442695, %v321_v41 }
 0x184   : > { %1174 = vrot.lane.b32.xlu1 %v2353_v1, %s2246_s6  ;;  %v668_v48 = vpop.permute.xlu0 %667  ;;  %s2159_s6 = scalar_lea.vmem %s2158_s5, 256 }
 0x185   : > { %2105 = vpow2.f32 %v322_v42 }
 0x18d   : > { %1005 = vrot.lane.b32.xlu0 %v2353_v1, %s2247_s7  ;;  %s2256_s7 = smov 24  }
 0x18f   : > { %v2422_v44 = vpop.eup %2105 }
 0x190   : > { %1936 = vmatmul.mubr.msk.f32.vlgmr.msra.gmra.mrb[2].mxu0 %vm314_vm2, %v2422_v44 }
 0x191   : > { %1343 = vrot.lane.b32.xlu0 %v2353_v1, %s2248_s8  ;;  %1944 = vmatpush3.msra.mxu0 %v499_v43  ;;  %s2257_s8 = smov 28  }
 0x192   : > { %1945 = vmatprep.mubr.msk.f32.mxu0 %vm2234_vm0, %v2233_v0  ;;  %1953 = vmatprep.subr.mxu0 %v2233_v0 }
 0x1a8   : > { %1330 = vmax.xlane.f32.xlu1 %v1329_v45 }
 0x1ac   : > { %1499 = vmax.xlane.f32.xlu1 %v1498_v46 }
 0x1bd   : > { %1512 = vrot.lane.b32.xlu1 %v2353_v1, %s2249_s9  ;;  %s221_s9 = sand.u32 1, %s2215_s16  }
 0x1be   : > { %s1756_s29 = scalar_lea.sflag [#allocation3], %s221_s9 }
 0x1f4   : > { %v2435_v49 = vpop.xlane.xlu1 %485 }
 0x1f5   : > { %v490_v50 = vsub.f32 %v480_v21, %v2435_v49  ;;  %v487_v32 = vsub.f32 -inf, %v2435_v49 }
 0x1f7   : > { %v491_v51 = vmul.f32 1.442695, %v490_v50  ;;  %v488_v34 = vmul.f32 1.442695, %v487_v32 }
 0x1f8   : > { %v2438_v52 = vpop.xlane.xlu0 %654 }
 0x1f9   : > { %v659_v53 = vsub.f32 %v649_v24, %v2438_v52  ;;  %2107 = vpow2.f32 %v491_v51  ;;  %v325_v24 = vsel %vm314_vm2, %v2422_v44, 0.0 }
 0x1fb   : > { %v660_v54 = vmul.f32 1.442695, %v659_v53 }
 0x1fc   : > { %v2441_v55 = vpop.xlane.xlu0 %823 }
 0x1fd   : > { %v828_v56 = vsub.f32 %v818_v27, %v2441_v55  ;;  %2109 = vpow2.f32 %v660_v54  ;;  %v319_v27 = vmul.f32 1.442695, %v318_v26  ;;  %v825_v35 = vsub.f32 -inf, %v2441_v55 }
 0x1ff   : > { %v829_v57 = vmul.f32 1.442695, %v828_v56  ;;  %v826_v37 = vmul.f32 1.442695, %v825_v35 }
 0x200   : > { %v2444_v58 = vpop.xlane.xlu1 %992 }
 0x201   : > { %v997_v59 = vsub.f32 %v987_v30, %v2444_v58  ;;  %2111 = vpow2.f32 %v829_v57 }
 0x203   : > { %v998_v60 = vmul.f32 1.442695, %v997_v59  ;;  %v2108_v61 = vpop.eup %2107 }
 0x204   : > { %v2447_v62 = vpop.xlane.xlu0 %1161  ;;  %1946 = vmatmul.mubr.msk.f32.vlgmr.msra.gmra.mrb[4].mxu0 %vm314_vm2, %v2108_v61  ;;  %v494_v1 = vsel %vm314_vm2, %v2108_v61, 0.0  ;;  %v1175_v9 = vpop.permute.xlu1 %1174 }
 0x205   : > { %v1166_v63 = vsub.f32 %v1156_v33, %v2447_v62  ;;  %2113 = vpow2.f32 %v998_v60  ;;  %1954 = vmatpush3.msra.mxu0 %v668_v48  ;;  %495 = vadd.xlane.f32.xlu0 %v494_v1  ;;  %v656_v33 = vsub.f32 -inf, %v2438_v52  ;;  %v1163_v40 = vsub.f32 -inf, %v2447_v62 }
 0x206   : > { %1955 = vmatprep.mubr.msk.f32.mxu0 %vm2234_vm0, %v2233_v0  ;;  %1963 = vmatprep.subr.mxu0 %v2233_v0 }
 0x207   : > { %v1167_v2 = vmul.f32 1.442695, %v1166_v63  ;;  %v2110_v3 = vpop.eup %2109  ;;  %v1164_v42 = vmul.f32 1.442695, %v1163_v40 }
 0x208   : > { %1956 = vmatmul.mubr.msk.f32.vlgmr.msra.gmra.mrb[6].mxu0 %vm314_vm2, %v2110_v3  ;;  %v663_v4 = vsel %vm314_vm2, %v2110_v3, 0.0  ;;  %v1006_v5 = vpop.permute.xlu0 %1005 }
 0x209   : > { %2115 = vpow2.f32 %v1167_v2  ;;  %1964 = vmatpush3.msra.mxu0 %v837_v47  ;;  %664 = vadd.xlane.f32.xlu1 %v663_v4 }
 0x20a   : > { %1965 = vmatprep.mubr.msk.f32.mxu0 %vm2234_vm0, %v2233_v0  ;;  %1973 = vmatprep.subr.mxu0 %v2233_v0 }
 0x20b   : > { %v2112_v6 = vpop.eup %2111 }
 0x20c   : > { %1966 = vmatmul.mubr.msk.f32.vlgmr.msra.gmra.mrb[8].mxu0 %vm314_vm2, %v2112_v6  ;;  %v832_v7 = vsel %vm314_vm2, %v2112_v6, 0.0  ;;  %v1344_v11 = vpop.permute.xlu0 %1343 }
 0x20d   : > { %833 = vadd.xlane.f32.xlu0 %v832_v7  ;;  %1974 = vmatpush3.msra.mxu0 %v1006_v5 }
 0x20e   : > { %1975 = vmatprep.mubr.msk.f32.mxu0 %vm2234_vm0, %v2233_v0  ;;  %1983 = vmatprep.subr.mxu0 %v2233_v0 }
 0x20f   : > { %v2114_v8 = vpop.eup %2113 }
 0x210   : > { %1976 = vmatmul.mubr.msk.f32.vlgmr.msra.gmra.mrb[10].mxu0 %vm314_vm2, %v2114_v8  ;;  %v1001_v10 = vsel %vm314_vm2, %v2114_v8, 0.0 }
 0x211   : > { %1984 = vmatpush3.msra.mxu0 %v1175_v9  ;;  %1002 = vadd.xlane.f32.xlu0 %v1001_v10 }
 0x212   : > { %1985 = vmatprep.mubr.msk.f32.mxu0 %vm2234_vm0, %v2233_v0  ;;  %1993 = vmatprep.subr.mxu0 %v2233_v0 }
 0x213   : > { %v2116_v12 = vpop.eup %2115 }
 0x214   : > { %1986 = vmatmul.mubr.msk.f32.vlgmr.msra.gmra.mrb[12].mxu0 %vm314_vm2, %v2116_v12  ;;  %v1170_v13 = vsel %vm314_vm2, %v2116_v12, 0.0 }
 0x215   : > { %1171 = vadd.xlane.f32.xlu1 %v1170_v13  ;;  %1994 = vmatpush3.msra.mxu0 %v1344_v11 }
 0x216   : > { %1995 = vmatprep.mubr.msk.f32.mxu0 %vm2234_vm0, %v2233_v0  ;;  %2003 = vmatprep.subr.mxu0 %v2233_v0 }
 0x235   : > { %v2475_v14 = vpop.xlane.xlu1 %1330 }
 0x236   : > { %v1335_v15 = vsub.f32 %v2413_v36, %v2475_v14  ;;  %v657_v36 = vmul.f32 1.442695, %v656_v33 }
 0x238   : > { %v1336_v16 = vmul.f32 1.442695, %v1335_v15 }
 0x239   : > { %v2479_v17 = vpop.xlane.xlu1 %1499 }
 0x23a   : > { %v1504_v18 = vsub.f32 %v2415_v38, %v2479_v17  ;;  %2117 = vpow2.f32 %v1336_v16  ;;  %v994_v38 = vsub.f32 -inf, %v2444_v58 }
 0x23c   : > { %v1505_v19 = vmul.f32 1.442695, %v1504_v18  ;;  %v995_v39 = vmul.f32 1.442695, %v994_v38 }
 0x23d   : > { %v1513_v20 = vpop.permute.xlu1 %1512 }
 0x23e   : > { %2119 = vpow2.f32 %v1505_v19 }
 0x23f   : > { %2121 = vpow2.f32 %v319_v27 }
 0x240   : > { %2123 = vpow2.f32 %v488_v34  ;;  %v2252_v34 = vmov 0.0|0.0  }
 0x241   : > { %2125 = vpow2.f32 %v657_v36  ;;  %2019 = vmatprep.subr.bf16.mxu1 %v2252_v34 }
 0x242   : > { %2127 = vpow2.f32 %v826_v37 }
 0x243   : > { %2129 = vpow2.f32 %v995_v39 }
 0x244   : > { %v2118_v21 = vpop.eup %2117  ;;  %2131 = vpow2.f32 %v1164_v42 }
 0x245   : > { %1996 = vmatmul.mubr.msk.f32.vlgmr.msra.gmra.mrb[14].mxu0 %vm314_vm2, %v2118_v21  ;;  %v1339_v22 = vsel %vm314_vm2, %v2118_v21, 0.0 }
 0x246   : > { %2004 = vmatpush3.msra.mxu0 %v1513_v20  ;;  %1340 = vadd.xlane.f32.xlu0 %v1339_v22 }
 0x247   : > { %2005 = vmatprep.mubr.msk.f32.mxu0 %vm2234_vm0, %v2233_v0 }
 0x248   : > { %v2120_v23 = vpop.eup %2119 }
 0x249   : > { %2006 = vmatmul.mubr.msk.f32.vlgmr.msra.gmra.mrb[16].mxu0 %vm314_vm2, %v2120_v23  ;;  %v1508_v25 = vsel %vm314_vm2, %v2120_v23, 0.0  ;;  %v2122_v28 = vpop.eup %2121 }
 0x24a   : > { %326 = vadd.xlane.f32.xlu0 %v325_v24  ;;  %1509 = vadd.xlane.f32.xlu1 %v1508_v25  ;;  %v324_v29 = vmul.f32 0.0, %v2122_v28  ;;  %v2124_v41 = vpop.eup %2123  ;;  %v1669_v28 = vld [vmem:[%s2578_s2] sm:$0xff] }
 0x24b   : > { %v2126_v44 = vpop.eup %2125  ;;  %v493_v45 = vmul.f32 0.0, %v2124_v41 }
 0x24c   : > { %v2128_v48 = vpop.eup %2127  ;;  %v662_v49 = vmul.f32 0.0, %v2126_v44 }
 0x24d   : > { %v831_v52 = vmul.f32 0.0, %v2128_v48  ;;  %v2130_v53 = vpop.eup %2129 }
 0x24e   : > { %v1000_v56 = vmul.f32 0.0, %v2130_v53  ;;  %v2132_v57 = vpop.eup %2131 }
 0x24f   : > { %v1169_v60 = vmul.f32 0.0, %v2132_v57 }
 0x263   : > { %v401_v30 = vpop.f32.mrb[2].mxu0 }
 0x264   : > { %v2492_v31 = vadd.f32 %v401_v30, %v324_v29  ;;  %v1937_v0 = vpop.f32.mrb[3].mxu0 }
 0x292   : > { %v496_v43 = vpop.xlane.xlu0 %495 }
 0x293   : > { %v497_v46 = vadd.f32 %v496_v43, %v493_v45 }
 0x295   : > { %2133 = vrcp.f32 %v497_v46 }
 0x296   : > { %v665_v47 = vpop.xlane.xlu1 %664 }
 0x297   : > { %v666_v51 = vadd.f32 %v665_v47, %v662_v49 }
 0x299   : > { %2135 = vrcp.f32 %v666_v51 }
 0x29a   : > { %v834_v50 = vpop.xlane.xlu0 %833 }
 0x29b   : > { %v835_v54 = vadd.f32 %v834_v50, %v831_v52  ;;  %v1332_v50 = vsub.f32 -inf, %v2475_v14 }
 0x29d   : > { %2137 = vrcp.f32 %v835_v54 }
 0x29e   : > { %v1003_v55 = vpop.xlane.xlu0 %1002 }
 0x29f   : > { %v1004_v58 = vadd.f32 %v1003_v55, %v1000_v56  ;;  %v2134_v61 = vpop.eup %2133  ;;  %v1501_v55 = vsub.f32 -inf, %v2479_v17  ;;  %v1672_v17 = vld [vmem:[%s2578_s2 + $0x18] sm:$0xff] }
 0x2a0   : > { %v1595_v1 = vmul.f32 %v2134_v61, %v497_v46 }
 0x2a1   : > { %2139 = vrcp.f32 %v1004_v58 }
 0x2a2   : > { %v1172_v59 = vpop.xlane.xlu1 %1171  ;;  %v1596_v5 = vsub.f32 2.0, %v1595_v1 }
 0x2a3   : > { %v1173_v62 = vadd.f32 %v1172_v59, %v1169_v60  ;;  %v2136_v63 = vpop.eup %2135 }
 0x2a4   : > { %v1600_v4 = vmul.f32 %v2136_v63, %v666_v51  ;;  %v1597_v13 = vmul.f32 %v2134_v61, %v1596_v5 }
 0x2a5   : > { %2141 = vrcp.f32 %v1173_v62 }
 0x2a6   : > { %v1601_v8 = vsub.f32 2.0, %v1600_v4 }
 0x2a7   : > { %v2138_v3 = vpop.eup %2137 }
 0x2a8   : > { %v1605_v6 = vmul.f32 %v2138_v3, %v835_v54  ;;  %v1602_v22 = vmul.f32 %v2136_v63, %v1601_v8  ;;  %v1333_v54 = vmul.f32 1.442695, %v1332_v50 }
 0x2aa   : > { %v1606_v16 = vsub.f32 2.0, %v1605_v6 }
 0x2ab   : > { %v2140_v11 = vpop.eup %2139 }
 0x2ac   : > { %v1610_v20 = vmul.f32 %v2140_v11, %v1004_v58  ;;  %v1607_v27 = vmul.f32 %v2138_v3, %v1606_v16 }
 0x2ae   : > { %v1611_v30 = vsub.f32 2.0, %v1610_v20 }
 0x2af   : > { %v2142_v24 = vpop.eup %2141 }
 0x2b0   : > { %v1615_v0 = vmul.f32 %v2142_v24, %v1173_v62  ;;  %v1612_v40 = vmul.f32 %v2140_v11, %v1611_v30 }
 0x2b2   : > { %v1616_v38 = vsub.f32 2.0, %v1615_v0 }
 0x2b4   : > { %v1617_v48 = vmul.f32 %v2142_v24, %v1616_v38 }
 0x2d3   : > { %v2499_v2 = vpop.xlane.xlu0 %1340 }
 0x2d7   : > { %v327_v7 = vpop.xlane.xlu0 %326  ;;  %v570_v10 = vpop.f32.mrb[4].mxu0 }
 0x2d8   : > { %v328_v9 = vadd.f32 %v327_v7, %v324_v29  ;;  %v574_v12 = vadd.f32 %v570_v10, %v493_v45  ;;  %v1947_v15 = vpop.f32.mrb[5].mxu0  ;;  %v1670_v29 = vld [vmem:[%s2578_s2 + $0x8] sm:$0xff]  ;;  %v1510_v61 = vpop.xlane.xlu1 %1509 }
 0x2d9   : > { %v2020_v35 = vpack.c.bf16 %v1670_v29, %v1669_v28 }
 0x2da   : > { %2143 = vrcp.f32 %v328_v9  ;;  %v1598_v18 = vmul.f32 %v1597_v13, %v574_v12 }
 0x2db   : > { %v739_v19 = vpop.f32.mrb[6].mxu0  ;;  %2021 = vmatpush3.bf16.msra.mxu1 %v2020_v35  ;;  %2145 = vpow2.f32 %v1333_v54 }
 0x2dc   : > { %v743_v21 = vadd.f32 %v739_v19, %v662_v49  ;;  %v1957_v23 = vpop.f32.mrb[7].mxu0  ;;  %1630 = vrot.lane.b32.xlu1 %v1598_v18, %s2250_s10  ;;  %2022 = vmatprep.subr.bf16.mxu1 %v2252_v34  ;;  %s1858_s10 = sshll.u32 %s221_s9, 3 }
 0x2dd   : > { %s223_s14 = scalar_lea.vmem [#allocation2], %s1858_s10 }
 0x2de   : > { %v1603_v25 = vmul.f32 %v1602_v22, %v743_v21 }
 0x2df   : > { %v908_v26 = vpop.f32.mrb[8].mxu0 }
 0x2e0   : > { %v912_v32 = vadd.f32 %v908_v26, %v831_v52  ;;  %1634 = vrot.lane.b32.xlu0 %v1603_v25, %s2251_s21  ;;  %v1967_v33 = vpop.f32.mrb[9].mxu0  ;;  %s1770_s21 = sshll.u32 %s223_s14, 4  ;;  %s2530_s21 = int_to_ptr.vmem [resolvable:$true] %s1770_s21 }
 0x2e1   : > { %v1885_v33 = vld [vmem:[%s2579_s3] ss:$0 sm:$0xff]  ;;  %s2153_s30 = scalar_lea.vmem %s2530_s21, 128  ;;  %p2160_p1 = scmp.lt.s32.totalorder %s2530_s21, %s2158_s5 }
 0x2e2   : > { %v1608_v36 = vmul.f32 %v1607_v27, %v912_v32  ;;  %p2154_p12 = scmp.ne.s32.totalorder %s2530_s21, %s2153_s30  ;;  %p2161_p2 = scmp.lt.s32.totalorder %s2159_s6, %s2153_s30 }
 0x2e3   : > { %v1077_v37 = vpop.f32.mrb[10].mxu0 }
 0x2e4   : > { %v1081_v39 = vadd.f32 %v1077_v37, %v1000_v56  ;;  %1638 = vrot.lane.b32.xlu1 %v1608_v36, %s2253_s22  ;;  %v1977_v41 = vpop.f32.mrb[11].mxu0  ;;  %v2144_v42 = vpop.eup %2143  ;;  %v1502_v56 = vmul.f32 1.442695, %v1501_v55  ;;  %p2155_p13 = pnand %p2154_p12, %p2324_p4  ;;  %p2162_p3 = por %p2161_p2, %p2160_p1 }
 0x2e5   : > { %v1590_v43 = vmul.f32 %v2144_v42, %v328_v9  ;;  %v2146_v57 = vpop.eup %2145 }
 0x2e6   : > { %v1613_v44 = vmul.f32 %v1612_v40, %v1081_v39  ;;  %2147 = vpow2.f32 %v1502_v56  ;;  %v1338_v58 = vmul.f32 0.0, %v2146_v57  ;;  %p2156_p0 = pneg %p2155_p13 }
 0x2e7   : > { %v1246_v45 = vpop.f32.mrb[12].mxu0  ;;  %v1591_v46 = vsub.f32 2.0, %v1590_v43 }
 0x2e8   : > { %v1250_v47 = vadd.f32 %v1246_v45, %v1169_v60  ;;  %1642 = vrot.lane.b32.xlu1 %v1613_v44, %s2254_s24  ;;  %v1987_v49 = vpop.f32.mrb[13].mxu0  ;;  %v1342_v60 = vadd.f32 %v2499_v2, %v1338_v58  ;;  %p2163_p5 = pnand %p2162_p3, %p2156_p0 }
 0x2e9   : > { %v1592_v51 = vmul.f32 %v2144_v42, %v1591_v46 }
 0x2ea   : > { %v1618_v52 = vmul.f32 %v1617_v48, %v1250_v47  ;;  %2149 = vrcp.f32 %v1342_v60 }
 0x2eb   : > { %v1593_v53 = vmul.f32 %v1592_v51, %v2492_v31  ;;  %v1671_v31 = vld [vmem:[%s2578_s2 + $0x10] sm:$0xff] }
 0x2ec   : > { %1646 = vrot.lane.b32.xlu0 %v1618_v52, %s2255_s26  ;;  %v2023_v3 = vpack.c.bf16 %v1672_v17, %v1671_v31  ;;  %s2528_s26 = scalar_lea.hbm %s2580_s4, %s1888_s13 }
 0x2ee   : > { %2024 = vmatpush3.bf16.msra.mxu1 %v2023_v3 }
 0x2f0   : > { %v2148_v59 = vpop.eup %2147 }
 0x2f1   : > { %v1507_v62 = vmul.f32 0.0, %v2148_v59 }
 0x2f3   : > { %v1511_v14 = vadd.f32 %v1510_v61, %v1507_v62 }
 0x2f4   : > { %v2150_v63 = vpop.eup %2149 }
 0x2f5   : > { %2151 = vrcp.f32 %v1511_v14  ;;  %v1620_v1 = vmul.f32 %v2150_v63, %v1342_v60 }
 0x2f7   : > { %v1621_v5 = vsub.f32 2.0, %v1620_v1 }
 0x2f9   : > { %v1622_v9 = vmul.f32 %v2150_v63, %v1621_v5 }
 0x2ff   : > { %v2152_v4 = vpop.eup %2151 }
 0x300   : > { %v1625_v2 = vmul.f32 %v2152_v4, %v1511_v14 }
 0x302   : > { %v1626_v7 = vsub.f32 2.0, %v1625_v2 }
 0x304   : > { %v1627_v15 = vmul.f32 %v2152_v4, %v1626_v7 }
 0x318   : > { %v1415_v6 = vpop.f32.mrb[14].mxu0 }
 0x319   : > { %v1419_v8 = vadd.f32 %v1415_v6, %v1338_v58  ;;  %v1997_v10 = vpop.f32.mrb[15].mxu0 }
 0x31b   : > { %v1623_v11 = vmul.f32 %v1622_v9, %v1419_v8 }
 0x31c   : > { %v1584_v12 = vpop.f32.mrb[16].mxu0 }
 0x31d   : > { %v1588_v13 = vadd.f32 %v1584_v12, %v1507_v62  ;;  %1650 = vrot.lane.b32.xlu1 %v1623_v11, %s2256_s7  ;;  %v2007_v16 = vpop.f32.mrb[17].mxu0 }
 0x31f   : > { %v1628_v18 = vmul.f32 %v1627_v15, %v1588_v13 }
 0x321   : > { %1654 = vrot.lane.b32.xlu0 %v1628_v18, %s2257_s8 }
 0x34e   : > { %v1631_v19 = vpop.permute.xlu1 %1630 }
 0x34f   : > { %v1657_v23 = vsel %vm237_vm1, %v1593_v53, %v1631_v19 }
 0x352   : > { %v1635_v21 = vpop.permute.xlu0 %1634 }
 0x353   : > { %v1658_v24 = vsel %vm314_vm2, %v1657_v23, %v1635_v21 }
 0x356   : > { %v1639_v20 = vpop.permute.xlu1 %1638 }
 0x357   : > { %v1660_v26 = vsel %vm1659_vm3, %v1658_v24, %v1639_v20 }
 0x35a   : > { %v1643_v22 = vpop.permute.xlu1 %1642 }
 0x35b   : > { %v1662_v28 = vsel %vm1661_vm4, %v1660_v26, %v1643_v22 }
 0x35e   : > { %v1647_v25 = vpop.permute.xlu0 %1646 }
 0x35f   : > { %v1664_v29 = vsel %vm1663_vm5, %v1662_v28, %v1647_v25 }
 0x38f   : > { %v1651_v27 = vpop.permute.xlu1 %1650 }
 0x390   : > { %v1666_v30 = vsel %vm1665_vm6, %v1664_v29, %v1651_v27 }
 0x393   : > { %v1655_v0 = vpop.permute.xlu0 %1654 }
 0x394   : > { %v1668_v32 = vsel %vm1667_vm7, %v1666_v30, %v1655_v0 }
 0x395   : > { %2017 = vmatmul.mubr.msk.f32.vlgmr.msra.gmra.mrb[14].mxu1 %vm1680_vm8, %v1668_v32 }
 0x468   : > { %v1750_v34 = vpop.f32.mrb[14].mxu1 }
 0x469   : > { %v1751_v35 = vadd.f32 %v1885_v33, %v1750_v34  ;;  %v2018_v36 = vpop.f32.mrb[15].mxu1 }
 0x46b   : > { %1754 = vst.msk [vmem:[%s223_s14] sm:$0xff] %vm1680_vm8, %v1751_v35 }
 0x46c   : > { %2166 = shalt.err (!%p2163_p5)
}
 0x46d   : > { %s2167_s7 = scalar_lea.hbm %s2528_s26, 128  ;;  %s2171_s10 = scalar_lea.hbm %s2580_s4, 256 }
 0x46e   : > { %p2168_p6 = scmp.ne.s32.totalorder %s2528_s26, %s2167_s7  ;;  %p2172_p10 = scmp.lt.u32.totalorder %s2528_s26, %s2580_s4 }
 0x46f   : > { %p2173_p11 = scmp.lt.u32.totalorder %s2171_s10, %s2167_s7  ;;  %p2175_p13 = scmp.lt.u32.totalorder %s2167_s7, %s2528_s26 }
 0x470   : > { %p2169_p7 = pnand %p2168_p6, %p2324_p4 }
 0x471   : > { %p2174_p12 = por %p2173_p11, %p2172_p10 }
 0x472   : > { %p2170_p9 = pneg %p2169_p7 }
 0x473   : > { %p2176_p0 = por %p2175_p13, %p2174_p12 }
 0x475   : > { %p2177_p1 = pnand %p2176_p0, %p2170_p9 }
 0x477   : > { %2180 = shalt.err (!%p2177_p1)
}
 0x478   : > { %2025 = dma.vmem_to_hbm [thread:$0]  (%p2324_p4), %s2530_s21, 128, %s2528_s26, %s1756_s29  }
 0x479 PF: > { %p2031_p2 = scmp.ge.s32.totalorder %s2231_s20, 2  ;;  %s1782_s13 = sand.u32 1, %s2211_s15  }
 0x47a   : > { %s1783_s14 = scalar_lea.sflag [#allocation3], %s1782_s13 }
 0x47b   : > { %p2028_p3 = pnand %p2031_p2, %p2331_p8 }
 0x47d   : > { %2206 = dma.done.wait (!%p2028_p3), %s1783_s14, 128  }
 0x47e   : > { %2208 = vsyncadd (!%p2028_p3), %s1783_s14, 4294967168  ;;  %s17_s20 = sadd.s32 1, %s2231_s20   ;;  %s2583_s15 = smov %s2215_s16 }
 0x47f   : > { %p14_p5 = scmp.ge.s32.totalorder %s17_s20, 4   ;;  %s2584_s16 = smov %s2219_s17 }
 0x480   : > { %s2585_s17 = smov %s2337_s28  ;;  %s2586_s18 = smov %s2227_s19 }
 0x481   : > { %s2587_s19 = smov %s2589_s23  ;;  %16 = sbr.rel (!%p14_p5) target bundleno = 4 (0x4), region = 74 }
 0x488   :  { %1788 = vsyncpa [#allocation3], 1 }
 0x489   :  { %1790 = vsyncpa [#allocation3 + $0x1], 1 }

</bundles_post_ra>
